<compile_context>
chip_gen: v5e
topology: v5e:2x2
jax: 0.10.0
libtpu: 0.0.40
codegen_flags: <defaults>
</compile_context>

<pallas_src>
import functools

import jax
import jax.numpy as jnp
from jax import lax
from jax.experimental import pallas as pl
from jax.experimental.pallas import tpu as pltpu


def _dsconv_kernel(xf_ref, wd_ref, dwb_ref, wp_ref, pwb_ref, o_ref,
                   *, wp2, so, b_tile, matmul_dtype):
    # xf_ref : (B_tile, SP_pad, C)  channels-last, zero-padded, spatially flattened
    # wd_ref : (9, C)               tap-major depthwise weights (BN scale folded in)
    # dwb_ref: (1, C)               depthwise BN shift
    # wp_ref : (C, Cout)            pointwise weights (BN scale folded in)
    # pwb_ref: (1, Cout)            pointwise BN shift
    # o_ref  : (B_tile, SO, Cout)   SO = H*(W+2); junk columns stripped in the wrapper

    # Hoisted once per grid step (shared across the batch tile).
    wp = wp_ref[...].astype(matmul_dtype)               # (C, Cout)
    dwb = dwb_ref[...]                                  # (1, C)   broadcasts over rows
    pwb = pwb_ref[...]                                  # (1, Cout)
    wd_rows = [wd_ref[t:t + 1, :] for t in range(9)]    # 9 x (1, C) lane-dense rows
    tap_offs = [kh * wp2 + kw for kh in range(3) for kw in range(3)]

    for b in range(b_tile):
        # ---- depthwise 3x3: 9 taps == 9 contiguous sublane-offset row slices ----
        acc = xf_ref[b, 0:so, :] * wd_rows[0]
        for t in range(1, 9):
            off = tap_offs[t]
            acc = acc + xf_ref[b, off:off + so, :] * wd_rows[t]

        # depthwise BN shift (scale already folded into weights) + ReLU
        acc = jnp.maximum(acc + dwb, 0.0)

        # ---- pointwise 1x1 conv: (SO, C) @ (C, Cout) on the MXU ----
        out = jnp.dot(acc.astype(matmul_dtype), wp,
                      preferred_element_type=jnp.float32)

        # pointwise BN shift + ReLU
        out = jnp.maximum(out + pwb, 0.0)
        o_ref[b] = out.astype(o_ref.dtype)


def depthwise_separable_conv2d(x, w_dw, dw_scale, dw_shift, w_pw, pw_scale, pw_shift,
                               *, batch_tile=None, matmul_dtype=jnp.float32):
    """x: (N, C, H, W) float32.  Returns (N, Cout, H, W) float32.

    w_dw: (C, 3, 3) depthwise weights, w_pw: (Cout, C) pointwise weights,
    *_scale / *_shift: folded inference-mode BatchNorm scale/shift per channel.
    """
    N, C, H, W = x.shape
    Cout = w_pw.shape[0]
    Wp2 = W + 2
    SP = (H + 2) * Wp2          # padded spatial rows per element
    SO = H * Wp2                # output rows per element (incl. 2 junk cols per row)
    # Largest tap offset is 2*(W+2)+2, so pad flat rows to >= SP+2 (round to 8 sublanes).
    SP_pad = ((SP + 2 + 7) // 8) * 8

    # ---- one-time weight / layout transforms (plain XLA glue, tiny tensors) ----
    # conv-BN fold: multiply BN scale into the conv weights, keep only the shifts
    w_dw_f = (w_dw * dw_scale[:, None, None]).astype(jnp.float32)   # (C, 3, 3)
    w_pw_f = (w_pw * pw_scale[:, None]).astype(jnp.float32)         # (Cout, C)
    wd_taps = jnp.transpose(w_dw_f, (1, 2, 0)).reshape(9, C)        # (9, C) tap-major
    wp_t = jnp.transpose(w_pw_f, (1, 0))                            # (C, Cout)
    dwb = dw_shift.reshape(1, C).astype(jnp.float32)
    pwb = pw_shift.reshape(1, Cout).astype(jnp.float32)

    # channels-last, spatial pad=1, flatten (H+2)x(W+2) into rows, pad rows to SP_pad
    xt = jnp.transpose(x, (0, 2, 3, 1))                             # (N, H, W, C)
    xt = jnp.pad(xt, ((0, 0), (1, 1), (1, 1), (0, 0)))              # (N, H+2, W+2, C)
    xf = xt.reshape(N, SP, C)
    xf = jnp.pad(xf, ((0, 0), (0, SP_pad - SP), (0, 0)))            # (N, SP_pad, C)

    # ---- batch tile: amortize per-step overhead while keeping >=2 parallel steps ----
    elem_bytes = (SP_pad * C + SO * Cout) * 4
    if batch_tile is None:
        batch_tile = 1
        while (N % (batch_tile * 2) == 0
               and N // (batch_tile * 2) >= 2
               and (batch_tile * 2) * elem_bytes <= (4 << 20)):
            batch_tile *= 2
    assert N % batch_tile == 0
    grid = (N // batch_tile,)

    # ---- scoped-VMEM hint: only raised when the default 32 MiB would not cover the
    # double-buffered tiles + weights (keeps the small-shape path untouched). ----
    weight_bytes = (9 * C + C + C * Cout + Cout) * 4
    work_bytes = batch_tile * (SO * C + SO * Cout) * 4              # acc + matmul out
    need_bytes = 2 * batch_tile * elem_bytes + weight_bytes + work_bytes
    vmem_limit = None
    if need_bytes > (32 << 20):
        vmem_limit = min(int(need_bytes * 3 // 2), 64 << 20)

    # advisory cost hint for XLA scheduling around the custom call
    flops = N * (19 * SO * C + 2 * SO * C * Cout + 2 * SO * Cout)
    bytes_accessed = N * (SP_pad * C + SO * Cout) * 4 + weight_bytes
    cost = pl.CostEstimate(flops=flops, transcendentals=0,
                           bytes_accessed=bytes_accessed)

    kernel = functools.partial(_dsconv_kernel, wp2=Wp2, so=SO,
                               b_tile=batch_tile, matmul_dtype=matmul_dtype)

    grid_spec = pltpu.PrefetchScalarGridSpec(
        num_scalar_prefetch=0,
        grid=grid,
        in_specs=[
            pl.BlockSpec((batch_tile, SP_pad, C), lambda n: (n, 0, 0)),
            pl.BlockSpec((9, C), lambda n: (0, 0)),
            pl.BlockSpec((1, C), lambda n: (0, 0)),
            pl.BlockSpec((C, Cout), lambda n: (0, 0)),
            pl.BlockSpec((1, Cout), lambda n: (0, 0)),
        ],
        out_specs=pl.BlockSpec((batch_tile, SO, Cout), lambda n: (n, 0, 0)),
    )

    out_flat = pl.pallas_call(
        kernel,
        out_shape=jax.ShapeDtypeStruct((N, SO, Cout), jnp.float32),
        grid_spec=grid_spec,
        compiler_params=pltpu.CompilerParams(
            dimension_semantics=("parallel",),
            vmem_limit_bytes=vmem_limit),
        cost_estimate=cost,
    )(xf, wd_taps, dwb, wp_t, pwb)

    # strip the 2 junk columns per row and restore NCHW (wrapper-side plumbing)
    y = out_flat.reshape(N, H, Wp2, Cout)[:, :, :W, :]
    return jnp.transpose(y, (0, 3, 1, 2))


def _reference(x, w_dw, dw_scale, dw_shift, w_pw, pw_scale, pw_shift):
    """Pure-JAX reference using lax.conv_general_dilated (unfolded BN)."""
    C = x.shape[1]
    y = lax.conv_general_dilated(
        x, w_dw[:, None, :, :], window_strides=(1, 1), padding=((1, 1), (1, 1)),
        dimension_numbers=("NCHW", "OIHW", "NCHW"), feature_group_count=C)
    y = y * dw_scale[None, :, None, None] + dw_shift[None, :, None, None]
    y = jnp.maximum(y, 0.0)
    z = lax.conv_general_dilated(
        y, w_pw[:, :, None, None], window_strides=(1, 1), padding="VALID",
        dimension_numbers=("NCHW", "OIHW", "NCHW"))
    z = z * pw_scale[None, :, None, None] + pw_shift[None, :, None, None]
    return jnp.maximum(z, 0.0)


if __name__ == "__main__":
    key = jax.random.PRNGKey(0)
    N, Cin, Cout, H, W = 2, 4, 8, 16, 16
    eps = 1e-5

    ks = jax.random.split(key, 11)
    x = jax.random.normal(ks[0], (N, Cin, H, W), jnp.float32)

    # depthwise conv weight (Cin, 3, 3)  [PyTorch shape is (Cin, 1, 3, 3)]
    w_dw = jax.random.normal(ks[1], (Cin, 3, 3), jnp.float32) * 0.2
    # pointwise conv weight (Cout, Cin)  [PyTorch shape is (Cout, Cin, 1, 1)]
    w_pw = jax.random.normal(ks[2], (Cout, Cin), jnp.float32) * 0.2

    # BatchNorm parameters (inference mode), folded into scale/shift
    dw_gamma = 1.0 + 0.1 * jax.random.normal(ks[3], (Cin,), jnp.float32)
    dw_beta = 0.1 * jax.random.normal(ks[4], (Cin,), jnp.float32)
    dw_mean = 0.1 * jax.random.normal(ks[5], (Cin,), jnp.float32)
    dw_var = jnp.abs(jax.random.normal(ks[6], (Cin,), jnp.float32)) + 0.5

    pw_gamma = 1.0 + 0.1 * jax.random.normal(ks[7], (Cout,), jnp.float32)
    pw_beta = 0.1 * jax.random.normal(ks[8], (Cout,), jnp.float32)
    pw_mean = 0.1 * jax.random.normal(ks[9], (Cout,), jnp.float32)
    pw_var = jnp.abs(jax.random.normal(ks[10], (Cout,), jnp.float32)) + 0.5

    dw_scale = dw_gamma / jnp.sqrt(dw_var + eps)
    dw_shift = dw_beta - dw_mean * dw_scale
    pw_scale = pw_gamma / jnp.sqrt(pw_var + eps)
    pw_shift = pw_beta - pw_mean * pw_scale

    out = depthwise_separable_conv2d(x, w_dw, dw_scale, dw_shift,
                                     w_pw, pw_scale, pw_shift)
    out = jax.block_until_ready(out)

    ref = _reference(x, w_dw, dw_scale, dw_shift, w_pw, pw_scale, pw_shift)
    assert out.shape == (N, Cout, H, W)
    assert jnp.allclose(out, ref, atol=1e-4, rtol=1e-4), "mismatch vs JAX reference"

    print("KERNEL_OK")
</pallas_src>

<mosaic_0001>
module attributes {stable_mosaic.version = 11 : i64} {
  func.func @_dsconv_kernel(%arg0: i32, %arg1: memref<1x328x4xf32, #tpu.memory_space<vmem>>, %arg2: memref<9x4xf32, #tpu.memory_space<vmem>>, %arg3: memref<1x4xf32, #tpu.memory_space<vmem>>, %arg4: memref<4x8xf32, #tpu.memory_space<vmem>>, %arg5: memref<1x8xf32, #tpu.memory_space<vmem>>, %arg6: memref<1x288x8xf32, #tpu.memory_space<vmem>>) attributes {dimension_semantics = [#tpu.dimension_semantics<parallel>], iteration_bounds = array<i64: 2>, scalar_prefetch = 0 : i64, scratch_operands = 0 : i64, tpu.core_type = #tpu.core_type<tc>, window_params = [{transform_indices = @transform_0, window_bounds = array<i64: 1, 328, 4>}, {pipeline_mode = #tpu.pipeline_mode<synchronous>, transform_indices = @transform_1, window_bounds = array<i64: 9, 4>}, {pipeline_mode = #tpu.pipeline_mode<synchronous>, transform_indices = @transform_2, window_bounds = array<i64: 1, 4>}, {pipeline_mode = #tpu.pipeline_mode<synchronous>, transform_indices = @transform_3, window_bounds = array<i64: 4, 8>}, {pipeline_mode = #tpu.pipeline_mode<synchronous>, transform_indices = @transform_4, window_bounds = array<i64: 1, 8>}, {transform_indices = @transform_5, window_bounds = array<i64: 1, 288, 8>}]} {
    %c0 = arith.constant 0 : index
    %c0_0 = arith.constant 0 : index
    %0 = vector.load %arg4[%c0, %c0_0] : memref<4x8xf32, #tpu.memory_space<vmem>>, vector<4x8xf32>
    %c0_1 = arith.constant 0 : index
    %c0_2 = arith.constant 0 : index
    %1 = vector.load %arg3[%c0_1, %c0_2] : memref<1x4xf32, #tpu.memory_space<vmem>>, vector<1x4xf32>
    %c0_3 = arith.constant 0 : index
    %c0_4 = arith.constant 0 : index
    %2 = vector.load %arg5[%c0_3, %c0_4] : memref<1x8xf32, #tpu.memory_space<vmem>>, vector<1x8xf32>
    %c0_5 = arith.constant 0 : index
    %c0_6 = arith.constant 0 : index
    %3 = vector.load %arg2[%c0_5, %c0_6] : memref<9x4xf32, #tpu.memory_space<vmem>>, vector<1x4xf32>
    %c1 = arith.constant 1 : index
    %c0_7 = arith.constant 0 : index
    %4 = vector.load %arg2[%c1, %c0_7] : memref<9x4xf32, #tpu.memory_space<vmem>>, vector<1x4xf32>
    %c2 = arith.constant 2 : index
    %c0_8 = arith.constant 0 : index
    %5 = vector.load %arg2[%c2, %c0_8] : memref<9x4xf32, #tpu.memory_space<vmem>>, vector<1x4xf32>
    %c3 = arith.constant 3 : index
    %c0_9 = arith.constant 0 : index
    %6 = vector.load %arg2[%c3, %c0_9] : memref<9x4xf32, #tpu.memory_space<vmem>>, vector<1x4xf32>
    %c4 = arith.constant 4 : index
    %c0_10 = arith.constant 0 : index
    %7 = vector.load %arg2[%c4, %c0_10] : memref<9x4xf32, #tpu.memory_space<vmem>>, vector<1x4xf32>
    %c5 = arith.constant 5 : index
    %c0_11 = arith.constant 0 : index
    %8 = vector.load %arg2[%c5, %c0_11] : memref<9x4xf32, #tpu.memory_space<vmem>>, vector<1x4xf32>
    %c6 = arith.constant 6 : index
    %c0_12 = arith.constant 0 : index
    %9 = vector.load %arg2[%c6, %c0_12] : memref<9x4xf32, #tpu.memory_space<vmem>>, vector<1x4xf32>
    %c7 = arith.constant 7 : index
    %c0_13 = arith.constant 0 : index
    %10 = vector.load %arg2[%c7, %c0_13] : memref<9x4xf32, #tpu.memory_space<vmem>>, vector<1x4xf32>
    %c8 = arith.constant 8 : index
    %c0_14 = arith.constant 0 : index
    %11 = vector.load %arg2[%c8, %c0_14] : memref<9x4xf32, #tpu.memory_space<vmem>>, vector<1x4xf32>
    %c0_15 = arith.constant 0 : index
    %c0_16 = arith.constant 0 : index
    %c0_17 = arith.constant 0 : index
    %12 = vector.load %arg1[%c0_15, %c0_16, %c0_17] : memref<1x328x4xf32, #tpu.memory_space<vmem>>, vector<1x288x4xf32>
    %13 = vector.shape_cast %12 : vector<1x288x4xf32> to vector<288x4xf32>
    %14 = vector.broadcast %3 : vector<1x4xf32> to vector<288x4xf32>
    %15 = arith.mulf %13, %14 : vector<288x4xf32>
    %c0_18 = arith.constant 0 : index
    %c1_19 = arith.constant 1 : index
    %c0_20 = arith.constant 0 : index
    %16 = vector.load %arg1[%c0_18, %c1_19, %c0_20] : memref<1x328x4xf32, #tpu.memory_space<vmem>>, vector<1x288x4xf32>
    %17 = vector.shape_cast %16 : vector<1x288x4xf32> to vector<288x4xf32>
    %18 = vector.broadcast %4 : vector<1x4xf32> to vector<288x4xf32>
    %19 = arith.mulf %17, %18 : vector<288x4xf32>
    %20 = arith.addf %15, %19 : vector<288x4xf32>
    %c0_21 = arith.constant 0 : index
    %c2_22 = arith.constant 2 : index
    %c0_23 = arith.constant 0 : index
    %21 = vector.load %arg1[%c0_21, %c2_22, %c0_23] : memref<1x328x4xf32, #tpu.memory_space<vmem>>, vector<1x288x4xf32>
    %22 = vector.shape_cast %21 : vector<1x288x4xf32> to vector<288x4xf32>
    %23 = vector.broadcast %5 : vector<1x4xf32> to vector<288x4xf32>
    %24 = arith.mulf %22, %23 : vector<288x4xf32>
    %25 = arith.addf %20, %24 : vector<288x4xf32>
    %c0_24 = arith.constant 0 : index
    %c18 = arith.constant 18 : index
    %c0_25 = arith.constant 0 : index
    %26 = vector.load %arg1[%c0_24, %c18, %c0_25] : memref<1x328x4xf32, #tpu.memory_space<vmem>>, vector<1x288x4xf32>
    %27 = vector.shape_cast %26 : vector<1x288x4xf32> to vector<288x4xf32>
    %28 = vector.broadcast %6 : vector<1x4xf32> to vector<288x4xf32>
    %29 = arith.mulf %27, %28 : vector<288x4xf32>
    %30 = arith.addf %25, %29 : vector<288x4xf32>
    %c0_26 = arith.constant 0 : index
    %c19 = arith.constant 19 : index
    %c0_27 = arith.constant 0 : index
    %31 = vector.load %arg1[%c0_26, %c19, %c0_27] : memref<1x328x4xf32, #tpu.memory_space<vmem>>, vector<1x288x4xf32>
    %32 = vector.shape_cast %31 : vector<1x288x4xf32> to vector<288x4xf32>
    %33 = vector.broadcast %7 : vector<1x4xf32> to vector<288x4xf32>
    %34 = arith.mulf %32, %33 : vector<288x4xf32>
    %35 = arith.addf %30, %34 : vector<288x4xf32>
    %c0_28 = arith.constant 0 : index
    %c20 = arith.constant 20 : index
    %c0_29 = arith.constant 0 : index
    %36 = vector.load %arg1[%c0_28, %c20, %c0_29] : memref<1x328x4xf32, #tpu.memory_space<vmem>>, vector<1x288x4xf32>
    %37 = vector.shape_cast %36 : vector<1x288x4xf32> to vector<288x4xf32>
    %38 = vector.broadcast %8 : vector<1x4xf32> to vector<288x4xf32>
    %39 = arith.mulf %37, %38 : vector<288x4xf32>
    %40 = arith.addf %35, %39 : vector<288x4xf32>
    %c0_30 = arith.constant 0 : index
    %c36 = arith.constant 36 : index
    %c0_31 = arith.constant 0 : index
    %41 = vector.load %arg1[%c0_30, %c36, %c0_31] : memref<1x328x4xf32, #tpu.memory_space<vmem>>, vector<1x288x4xf32>
    %42 = vector.shape_cast %41 : vector<1x288x4xf32> to vector<288x4xf32>
    %43 = vector.broadcast %9 : vector<1x4xf32> to vector<288x4xf32>
    %44 = arith.mulf %42, %43 : vector<288x4xf32>
    %45 = arith.addf %40, %44 : vector<288x4xf32>
    %c0_32 = arith.constant 0 : index
    %c37 = arith.constant 37 : index
    %c0_33 = arith.constant 0 : index
    %46 = vector.load %arg1[%c0_32, %c37, %c0_33] : memref<1x328x4xf32, #tpu.memory_space<vmem>>, vector<1x288x4xf32>
    %47 = vector.shape_cast %46 : vector<1x288x4xf32> to vector<288x4xf32>
    %48 = vector.broadcast %10 : vector<1x4xf32> to vector<288x4xf32>
    %49 = arith.mulf %47, %48 : vector<288x4xf32>
    %50 = arith.addf %45, %49 : vector<288x4xf32>
    %c0_34 = arith.constant 0 : index
    %c38 = arith.constant 38 : index
    %c0_35 = arith.constant 0 : index
    %51 = vector.load %arg1[%c0_34, %c38, %c0_35] : memref<1x328x4xf32, #tpu.memory_space<vmem>>, vector<1x288x4xf32>
    %52 = vector.shape_cast %51 : vector<1x288x4xf32> to vector<288x4xf32>
    %53 = vector.broadcast %11 : vector<1x4xf32> to vector<288x4xf32>
    %54 = arith.mulf %52, %53 : vector<288x4xf32>
    %55 = arith.addf %50, %54 : vector<288x4xf32>
    %56 = vector.broadcast %1 : vector<1x4xf32> to vector<288x4xf32>
    %57 = arith.addf %55, %56 : vector<288x4xf32>
    %cst = arith.constant 0.000000e+00 : f32
    %58 = vector.broadcast %cst : f32 to vector<288x4xf32>
    %59 = arith.maximumf %57, %58 : vector<288x4xf32>
    %cst_36 = arith.constant dense<0.000000e+00> : vector<288x8xf32>
    %60 = tpu.matmul %59, %0, %cst_36 {dimension_numbers = #tpu.dot_dimension_numbers<[1], [0], [0], [1], [0, 0, 1, 1], [], []>} : vector<288x4xf32>, vector<4x8xf32>, vector<288x8xf32> -> vector<288x8xf32>
    %61 = vector.broadcast %2 : vector<1x8xf32> to vector<288x8xf32>
    %62 = arith.addf %60, %61 : vector<288x8xf32>
    %cst_37 = arith.constant 0.000000e+00 : f32
    %63 = vector.broadcast %cst_37 : f32 to vector<288x8xf32>
    %64 = arith.maximumf %62, %63 : vector<288x8xf32>
    %c0_38 = arith.constant 0 : index
    %c0_39 = arith.constant 0 : index
    %c0_40 = arith.constant 0 : index
    %65 = vector.load %arg6[%c0_38, %c0_39, %c0_40] : memref<1x288x8xf32, #tpu.memory_space<vmem>>, vector<1x288x8xf32>
    %66 = vector.shape_cast %65 : vector<1x288x8xf32> to vector<288x8xf32>
    %67 = vector.shape_cast %64 : vector<288x8xf32> to vector<1x288x8xf32>
    tpu.vector_store %arg6[%c0_38, %c0_39, %c0_40], %67 {strides = array<i32>} : memref<1x288x8xf32, #tpu.memory_space<vmem>>, vector<1x288x8xf32>,
    return
  }
  func.func @transform_0(%arg0: i32) -> (i32, i32, i32) {
    %c0_i32 = arith.constant 0 : i32
    %c0_i32_0 = arith.constant 0 : i32
    %c0_i32_1 = arith.constant 0 : i32
    return %arg0, %c0_i32, %c0_i32_0 : i32, i32, i32
  }
  func.func @transform_1(%arg0: i32) -> (i32, i32) {
    %c0_i32 = arith.constant 0 : i32
    %c0_i32_0 = arith.constant 0 : i32
    %c0_i32_1 = arith.constant 0 : i32
    return %c0_i32, %c0_i32_0 : i32, i32
  }
  func.func @transform_2(%arg0: i32) -> (i32, i32) {
    %c0_i32 = arith.constant 0 : i32
    %c0_i32_0 = arith.constant 0 : i32
    %c0_i32_1 = arith.constant 0 : i32
    return %c0_i32, %c0_i32_0 : i32, i32
  }
  func.func @transform_3(%arg0: i32) -> (i32, i32) {
    %c0_i32 = arith.constant 0 : i32
    %c0_i32_0 = arith.constant 0 : i32
    %c0_i32_1 = arith.constant 0 : i32
    return %c0_i32, %c0_i32_0 : i32, i32
  }
  func.func @transform_4(%arg0: i32) -> (i32, i32) {
    %c0_i32 = arith.constant 0 : i32
    %c0_i32_0 = arith.constant 0 : i32
    %c0_i32_1 = arith.constant 0 : i32
    return %c0_i32, %c0_i32_0 : i32, i32
  }
  func.func @transform_5(%arg0: i32) -> (i32, i32, i32) {
    %c0_i32 = arith.constant 0 : i32
    %c0_i32_0 = arith.constant 0 : i32
    %c0_i32_1 = arith.constant 0 : i32
    return %arg0, %c0_i32, %c0_i32_0 : i32, i32, i32
  }
}

</mosaic_0001>

<bundles_post_ra>
// kernel: tpu_custom_call.1
= control target key start
LH: loop header
LB: loop body
LE: loop exit
PB: predicated region body
PF: predicated region fallthrough
CT: control target
= control target key end

     0   :  { %s1688_s18 = smov 0   ;;  %s2826_s0 = inlined_call_operand.vmem [shape: f32[2,328,4], index: 0, kind: input, shape index: {}]   ;;  %s2827_s1 = inlined_call_operand.vmem [shape: f32[9,4], index: 1, kind: input, shape index: {}]   ;;  %s2828_s2 = inlined_call_operand.vmem [shape: f32[1,4], index: 2, kind: input, shape index: {}]   ;;  %s2829_s3 = inlined_call_operand.vmem [shape: f32[4,8], index: 3, kind: input, shape index: {}]   ;;  %s2830_s4 = inlined_call_operand.vmem [shape: f32[1,8], index: 4, kind: input, shape index: {}]   ;;  %s2831_s5 = inlined_call_operand.vmem [shape: f32[2,288,8], index: 5, kind: output, shape index: {}]  }
   0x1 LB: > { %s1558_s19 = sadd.s32 4294967295, %s1656_s18   ;;  %p1562_p0 = scmp.ge.s32.totalorder %s1656_s18, 1  ;;  %s1656_s18 = sphi %s1688_s18, %s15_s18  }
   0x2   : > { %p187_p1 = scmp.lt.s32.totalorder %s1656_s18, 3 }
   0x4   : > { %p188_p2 = pnand %p1562_p0, %p187_p1 }
   0x5   : > { %p215_p3 = scmp.lt.s32.totalorder (!%p188_p2), %s1558_s19, 1 }
   0x6   : > { %191 = sbr.rel (%p188_p2) target bundleno = 331 (0x14b), region = 40 }
   0xb   : > { %v225_v0 = vld [vmem:[%s2829_s3] sm:$0xf]  ;;  %vm1301_vm0 = vcmask 1043456   ;;  %s2833_s19 = smov (!%p215_p3, %s1558_s19), 1  ;;  %v1730_v5 = vld [vmem:[%s2827_s1 + $0x4] ss:$0 sm:$0xff] }
   0xc   : > { %1605 = vmatpush.msk.msra.mxu2 %vm1301_vm0, %v225_v0  ;;  %1606 = vmatpush.msk.msra.mxu3 %vm1301_vm0, %v225_v0  ;;  %s1607_s22 = smul.u32 328, %s2833_s19  ;;  %v1705_v1 = vld [vmem:[%s2827_s1] ss:$0 sm:$0xff]  ;;  %v1710_v2 = vld [vmem:[%s2827_s1 + $0x1] ss:$0 sm:$0xff]  ;;  %vm1192_vm1 = vcmask 31744  }
   0xd   : > { %1565 = vmatpush.msk.msra.mxu0 %vm1301_vm0, %v225_v0  ;;  %1604 = vmatpush.msk.msra.mxu1 %vm1301_vm0, %v225_v0  ;;  %v1715_v3 = vld [vmem:[%s2827_s1 + $0x2] ss:$0 sm:$0xff]  ;;  %v1720_v4 = vld [vmem:[%s2827_s1 + $0x3] ss:$0 sm:$0xff]  ;;  %v1735_v6 = vld [vmem:[%s2827_s1 + $0x5] ss:$0 sm:$0xff] }
   0xe   : > { %s1725_s8 = scalar_lea.vmem %s2826_s0, %s1607_s22  ;;  %v1740_v7 = vld [vmem:[%s2827_s1 + $0x6] ss:$0 sm:$0xff]  ;;  %v1759_v18 = vld [vmem:[%s2827_s1 + $0x7] ss:$0 sm:$0xff]  ;;  %v1768_v23 = vld [vmem:[%s2827_s1 + $0x8] ss:$0 sm:$0xff] }
   0xf   : > { %v255_v8 = vld [vmem:[%s1725_s8 + $0x90] sm:$0xff]  ;;  %v1748_v13 = vld [vmem:[%s1725_s8 + $0xa2] sm:$0xff]  ;;  %v264_v26 = vld [vmem:[%s1725_s8 + $0xd8] sm:$0xff]  ;;  %s1608_s23 = smul.u32 288, %s2833_s19  ;;  %vm1466_vm2 = vcmask 64512  }
  0x10   : > { %v328_v9 = vld [vmem:[%s1725_s8 + $0x91] sm:$0xff]  ;;  %v292_v11 = vmul.f32 %v1705_v1, %v255_v8  ;;  %v621_v15 = vld [vmem:[%s1725_s8 + $0xa3] sm:$0xff]  ;;  %v549_v20 = vmul.f32 %v1720_v4, %v1748_v13  ;;  %v337_v27 = vld [vmem:[%s1725_s8 + $0xd9] sm:$0xff]  ;;  %v301_v31 = vmul.f32 %v1705_v1, %v264_v26 }
  0x11   : > { %v437_v10 = vld [vmem:[%s1725_s8 + $0x92] sm:$0xff]  ;;  %v365_v12 = vmul.f32 %v1710_v2, %v328_v9  ;;  %v730_v16 = vld [vmem:[%s1725_s8 + $0xa4] sm:$0xff]  ;;  %v658_v24 = vmul.f32 %v1730_v5, %v621_v15  ;;  %v446_v28 = vld [vmem:[%s1725_s8 + $0xda] sm:$0xff]  ;;  %v374_v32 = vmul.f32 %v1710_v2, %v337_v27  ;;  %s2704_s25 = scalar_lea.vmem %s2831_s5, %s1608_s23 }
  0x12   : > { %v474_v14 = vmul.f32 %v1715_v3, %v437_v10  ;;  %v1754_v17 = vld [vmem:[%s1725_s8 + $0xb4] sm:$0xff]  ;;  %v767_v25 = vmul.f32 %v1735_v6, %v730_v16  ;;  %v1780_v33 = vld [vmem:[%s1725_s8 + $0xea] sm:$0xff]  ;;  %v483_v38 = vmul.f32 %v1715_v3, %v446_v28  ;;  %v1792_v40 = vld [vmem:[%s1725_s8 + $0xfc] sm:$0xff] }
  0x13   : > { %v401_v19 = vadd.f32 %v365_v12, %v292_v11  ;;  %v914_v21 = vld [vmem:[%s1725_s8 + $0xb5] sm:$0xff]  ;;  %v842_v30 = vmul.f32 %v1740_v7, %v1754_v17  ;;  %v630_v34 = vld [vmem:[%s1725_s8 + $0xeb] sm:$0xff]  ;;  %v558_v39 = vmul.f32 %v1720_v4, %v1780_v33  ;;  %v923_v41 = vld [vmem:[%s1725_s8 + $0xfd] sm:$0xff]  ;;  %v410_v44 = vadd.f32 %v374_v32, %v301_v31 }
  0x14   : > { %v1023_v22 = vld [vmem:[%s1725_s8 + $0xb6] sm:$0xff]  ;;  %v739_v35 = vld [vmem:[%s1725_s8 + $0xec] sm:$0xff]  ;;  %v951_v36 = vmul.f32 %v1759_v18, %v914_v21  ;;  %v1032_v42 = vld [vmem:[%s1725_s8 + $0xfe] sm:$0xff]  ;;  %v667_v45 = vmul.f32 %v1730_v5, %v630_v34  ;;  %v851_v50 = vmul.f32 %v1740_v7, %v1792_v40  ;;  %v960_v59 = vmul.f32 %v1759_v18, %v923_v41 }
  0x15   : > { %v510_v29 = vadd.f32 %v474_v14, %v401_v19  ;;  %v1786_v37 = vmul.f32 %v1768_v23, %v1023_v22  ;;  %v776_v46 = vmul.f32 %v1735_v6, %v739_v35  ;;  %v237_v47 = vld [vmem:[%s1725_s8] sm:$0xff]  ;;  %v1806_v53 = vld [vmem:[%s1725_s8 + $0x12] sm:$0xff]  ;;  %v519_v58 = vadd.f32 %v483_v38, %v410_v44  ;;  %v246_v11 = vld [vmem:[%s1725_s8 + $0x48] sm:$0xff] }
  0x16   : > { %v310_v48 = vld [vmem:[%s1725_s8 + $0x1] sm:$0xff]  ;;  %v274_v51 = vmul.f32 %v1705_v1, %v237_v47  ;;  %v603_v55 = vld [vmem:[%s1725_s8 + $0x13] sm:$0xff]  ;;  %v1813_v60 = vmul.f32 %v1768_v23, %v1032_v42  ;;  %v531_v8 = vmul.f32 %v1720_v4, %v1806_v53  ;;  %v319_v12 = vld [vmem:[%s1725_s8 + $0x49] sm:$0xff] }
  0x17   : > { %v585_v43 = vadd.f32 %v549_v20, %v510_v29  ;;  %v419_v49 = vld [vmem:[%s1725_s8 + $0x2] sm:$0xff]  ;;  %v347_v52 = vmul.f32 %v1710_v2, %v310_v48  ;;  %v712_v56 = vld [vmem:[%s1725_s8 + $0x14] sm:$0xff]  ;;  %v640_v9 = vmul.f32 %v1730_v5, %v603_v55  ;;  %v428_v14 = vld [vmem:[%s1725_s8 + $0x4a] sm:$0xff]  ;;  %v594_v16 = vadd.f32 %v558_v39, %v519_v58 }
  0x18   : > { %v456_v54 = vmul.f32 %v1715_v3, %v419_v49  ;;  %v1816_v61 = vld [vmem:[%s1725_s8 + $0x24] sm:$0xff]  ;;  %v749_v10 = vmul.f32 %v1735_v6, %v712_v56  ;;  %v283_v20 = vmul.f32 %v1705_v1, %v246_v11  ;;  %v1831_v21 = vld [vmem:[%s1725_s8 + $0x5a] sm:$0xff]  ;;  %v465_v28 = vmul.f32 %v1715_v3, %v428_v14  ;;  %v1839_v29 = vld [vmem:[%s1725_s8 + $0x6c] sm:$0xff] }
  0x19   : > { %v694_v57 = vadd.f32 %v658_v24, %v585_v43  ;;  %v896_v62 = vld [vmem:[%s1725_s8 + $0x25] sm:$0xff]  ;;  %v383_v0 = vadd.f32 %v347_v52, %v274_v51  ;;  %v824_v19 = vmul.f32 %v1740_v7, %v1816_v61  ;;  %v612_v22 = vld [vmem:[%s1725_s8 + $0x5b] sm:$0xff]  ;;  %v703_v32 = vadd.f32 %v667_v45, %v594_v16  ;;  %v905_v48 = vld [vmem:[%s1725_s8 + $0x6d] sm:$0xff] }
  0x1a   : > { %v1005_v63 = vld [vmem:[%s1725_s8 + $0x26] sm:$0xff]  ;;  %v721_v24 = vld [vmem:[%s1725_s8 + $0x5c] sm:$0xff]  ;;  %v933_v27 = vmul.f32 %v1759_v18, %v896_v62  ;;  %v540_v35 = vmul.f32 %v1720_v4, %v1831_v21  ;;  %v649_v44 = vmul.f32 %v1730_v5, %v612_v22  ;;  %v833_v52 = vmul.f32 %v1740_v7, %v1839_v29 }
  0x1b   : > { %v803_v15 = vadd.f32 %v767_v25, %v694_v57  ;;  %v492_v26 = vadd.f32 %v456_v54, %v383_v0  ;;  %v356_v25 = vmul.f32 %v1710_v2, %v319_v12  ;;  %v1042_v34 = vmul.f32 %v1768_v23, %v1005_v63  ;;  %v256_v38 = vld [vmem:[%s1725_s8 + $0x98] sm:$0xff]  ;;  %v1854_v49 = vld [vmem:[%s2828_s2] ss:$0 sm:$0xff]  ;;  %v1860_v55 = vld [vmem:[%s1725_s8 + $0xaa] sm:$0xff] }
  0x1c   : > { %v329_v39 = vld [vmem:[%s1725_s8 + $0x99] sm:$0xff]  ;;  %v758_v47 = vmul.f32 %v1735_v6, %v721_v24  ;;  %v812_v51 = vadd.f32 %v776_v46, %v703_v32  ;;  %v293_v54 = vmul.f32 %v1705_v1, %v256_v38  ;;  %v622_v62 = vld [vmem:[%s1725_s8 + $0xab] sm:$0xff]  ;;  %v550_v16 = vmul.f32 %v1720_v4, %v1860_v55  ;;  %v338_v22 = vld [vmem:[%s1725_s8 + $0xe1] sm:$0xff] }
  0x1d   : > { %v878_v31 = vadd.f32 %v842_v30, %v803_v15  ;;  %v438_v41 = vld [vmem:[%s1725_s8 + $0x9a] sm:$0xff]  ;;  %v567_v42 = vadd.f32 %v531_v8, %v492_v26  ;;  %v392_v43 = vadd.f32 %v356_v25, %v283_v20  ;;  %v1014_v30 = vld [vmem:[%s1725_s8 + $0x6e] sm:$0xff]  ;;  %v942_v8 = vmul.f32 %v1759_v18, %v905_v48  ;;  %v447_v25 = vld [vmem:[%s1725_s8 + $0xe2] sm:$0xff] }
  0x1e   : > { %v475_v58 = vmul.f32 %v1715_v3, %v438_v41  ;;  %v731_v63 = vld [vmem:[%s1725_s8 + $0xac] sm:$0xff]  ;;  %v887_v0 = vadd.f32 %v851_v50, %v812_v51  ;;  %v1051_v11 = vmul.f32 %v1768_v23, %v1014_v30  ;;  %v1870_v12 = vld [vmem:[%s1725_s8 + $0xbc] sm:$0xff]  ;;  %v659_v24 = vmul.f32 %v1730_v5, %v622_v62  ;;  %v740_v51 = vld [vmem:[%s1725_s8 + $0xf4] sm:$0xff] }
  0x1f   : > { %v987_v45 = vadd.f32 %v951_v36, %v878_v31  ;;  %v676_v56 = vadd.f32 %v640_v9, %v567_v42  ;;  %v501_v57 = vadd.f32 %v465_v28, %v392_v43  ;;  %v366_v36 = vmul.f32 %v1710_v2, %v329_v39  ;;  %v265_v20 = vld [vmem:[%s1725_s8 + $0xe0] sm:$0xff]  ;;  %v1884_v38 = vld [vmem:[%s1725_s8 + $0xf2] sm:$0xff] }
  0x20   : > { %v996_v50 = vadd.f32 %v960_v59, %v887_v0  ;;  %v768_v26 = vmul.f32 %v1735_v6, %v731_v63  ;;  %v843_v32 = vmul.f32 %v1740_v7, %v1870_v12  ;;  %v1024_v41 = vld [vmem:[%s1725_s8 + $0xbe] sm:$0xff]  ;;  %v302_v42 = vmul.f32 %v1705_v1, %v265_v20  ;;  %v238_v63 = vld [vmem:[%s1725_s8 + $0x8] sm:$0xff] }
  0x21   : > { %v1096_v46 = vadd.f32 %v1786_v37, %v987_v45  ;;  %v785_v9 = vadd.f32 %v749_v10, %v676_v56  ;;  %v576_v14 = vadd.f32 %v540_v35, %v501_v57  ;;  %v402_v15 = vadd.f32 %v366_v36, %v293_v54  ;;  %v915_v35 = vld [vmem:[%s1725_s8 + $0xbd] sm:$0xff]  ;;  %v631_v45 = vld [vmem:[%s1725_s8 + $0xf3] sm:$0xff]  ;;  %v420_v0 = vld [vmem:[%s1725_s8 + $0xa] sm:$0xff] }
  0x22   : > { %v1105_v59 = vadd.f32 %v1813_v60, %v996_v50  ;;  %v375_v43 = vmul.f32 %v1710_v2, %v338_v22  ;;  %v484_v30 = vmul.f32 %v1715_v3, %v447_v25  ;;  %v952_v60 = vmul.f32 %v1759_v18, %v915_v35  ;;  %v1899_v57 = vld [vmem:[%s1725_s8 + $0x104] sm:$0xff] }
  0x23   : > { %v1135_v37 = vadd.f32 %v1854_v49, %v1096_v46  ;;  %v860_v28 = vadd.f32 %v824_v19, %v785_v9  ;;  %v685_v10 = vadd.f32 %v649_v44, %v576_v14  ;;  %v511_v31 = vadd.f32 %v475_v58, %v402_v15  ;;  %v311_v46 = vld [vmem:[%s1725_s8 + $0x9] sm:$0xff] }
  0x24   : > { %v1144_v54 = vadd.f32 %v1854_v49, %v1105_v59  ;;  %v411_v56 = vadd.f32 %v375_v43, %v302_v42  ;;  %v1061_v62 = vmul.f32 %v1768_v23, %v1024_v41  ;;  %v668_v15 = vmul.f32 %v1730_v5, %v631_v45  ;;  %v924_v20 = vld [vmem:[%s1725_s8 + $0x105] sm:$0xff]  ;;  %v247_v43 = vld [vmem:[%s1725_s8 + $0x50] sm:$0xff] }
  0x25   : > { %v1171_v39 = vmax.f32 %v1135_v37, 0.0  ;;  %v969_v48 = vadd.f32 %v933_v27, %v860_v28  ;;  %v794_v19 = vadd.f32 %v758_v47, %v685_v10  ;;  %v586_v44 = vadd.f32 %v550_v16, %v511_v31  ;;  %v1033_v50 = vld [vmem:[%s1725_s8 + $0x106] sm:$0xff]  ;;  %v604_v31 = vld [vmem:[%s1725_s8 + $0x1b] sm:$0xff]  ;;  %v320_v45 = vld [vmem:[%s1725_s8 + $0x51] sm:$0xff] }
  0x26   : > { %v559_v27 = vmul.f32 %v1720_v4, %v1884_v38  ;;  %v1180_v9 = vmax.f32 %v1144_v54, 0.0  ;;  %v520_v14 = vadd.f32 %v484_v30, %v411_v56  ;;  %v777_v16 = vmul.f32 %v1735_v6, %v740_v51  ;;  %v1923_v42 = vld [vmem:[%s1725_s8 + $0x2c] sm:$0xff] }
  0x27   : > { %1584 = vmatmul.msk.f32.vlgmr.msra.gmra.mxu2 %vm1192_vm1, %v1171_v39  ;;  %v1078_v47 = vadd.f32 %v1042_v34, %v969_v48  ;;  %v869_v36 = vadd.f32 %v833_v52, %v794_v19  ;;  %v695_v58 = vadd.f32 %v659_v24, %v586_v44  ;;  %v852_v37 = vmul.f32 %v1740_v7, %v1899_v57  ;;  %v1913_v24 = vld [vmem:[%s1725_s8 + $0x1a] sm:$0xff]  ;;  %v429_v51 = vld [vmem:[%s1725_s8 + $0x52] sm:$0xff] }
  0x28   : > { %1593 = vmatmul.msk.f32.vlgmr.msra.gmra.mxu3 %vm1192_vm1, %v1180_v9  ;;  %v595_v25 = vadd.f32 %v559_v27, %v520_v14  ;;  %v275_v28 = vmul.f32 %v1705_v1, %v238_v63  ;;  %v348_v10 = vmul.f32 %v1710_v2, %v311_v46  ;;  %v961_v41 = vmul.f32 %v1759_v18, %v924_v20  ;;  %v897_v27 = vld [vmem:[%s1725_s8 + $0x2d] sm:$0xff]  ;;  %v613_v9 = vld [vmem:[%s1725_s8 + $0x63] sm:$0xff] }
  0x29   : > { %v1117_v34 = vadd.f32 %v1854_v49, %v1078_v47  ;;  %v978_v22 = vadd.f32 %v942_v8, %v869_v36  ;;  %v804_v52 = vadd.f32 %v768_v26, %v695_v58  ;;  %v457_v8 = vmul.f32 %v1715_v3, %v420_v0  ;;  %v713_v26 = vld [vmem:[%s1725_s8 + $0x1c] sm:$0xff]  ;;  %v1006_v47 = vld [vmem:[%s1725_s8 + $0x2e] sm:$0xff] }
  0x2a   : > { %v704_v48 = vadd.f32 %v668_v15, %v595_v25  ;;  %v1070_v19 = vmul.f32 %v1768_v23, %v1033_v50  ;;  %v384_v44 = vadd.f32 %v348_v10, %v275_v28  ;;  %v532_v30 = vmul.f32 %v1720_v4, %v1913_v24  ;;  %v1941_v0 = vld [vmem:[%s1725_s8 + $0x62] sm:$0xff] }
  0x2b   : > { %v1153_v35 = vmax.f32 %v1117_v34, 0.0  ;;  %v1087_v39 = vadd.f32 %v1051_v11, %v978_v22  ;;  %v879_v59 = vadd.f32 %v843_v32, %v804_v52  ;;  %v641_v54 = vmul.f32 %v1730_v5, %v604_v31  ;;  %v722_v34 = vld [vmem:[%s1725_s8 + $0x64] sm:$0xff] }
  0x2c   : > { %v750_v56 = vmul.f32 %v1735_v6, %v713_v26  ;;  %v813_v36 = vadd.f32 %v777_v16, %v704_v48  ;;  %v493_v58 = vadd.f32 %v457_v8, %v384_v44  ;;  %v825_v63 = vmul.f32 %v1740_v7, %v1923_v42  ;;  %v1948_v16 = vld [vmem:[%s1725_s8 + $0x74] sm:$0xff]  ;;  %v257_v28 = vld [vmem:[%s1725_s8 + $0xa0] sm:$0xff] }
  0x2d   : > { %1566 = vmatmul.msk.f32.vlgmr.msra.gmra.mxu0 %vm1192_vm1, %v1153_v35  ;;  %v1126_v11 = vadd.f32 %v1854_v49, %v1087_v39  ;;  %v988_v32 = vadd.f32 %v952_v60, %v879_v59  ;;  %v284_v46 = vmul.f32 %v1705_v1, %v247_v43  ;;  %v357_v15 = vmul.f32 %v1710_v2, %v320_v45  ;;  %v330_v10 = vld [vmem:[%s1725_s8 + $0xa1] sm:$0xff]  ;;  %v906_v26 = vld [vmem:[%s1725_s8 + $0x75] sm:$0xff] }
  0x2e   : > { %v466_v20 = vmul.f32 %v1715_v3, %v429_v51  ;;  %v888_v22 = vadd.f32 %v852_v37, %v813_v36  ;;  %v568_v52 = vadd.f32 %v532_v30, %v493_v58  ;;  %v934_v50 = vmul.f32 %v1759_v18, %v897_v27  ;;  %v1015_v48 = vld [vmem:[%s1725_s8 + $0x76] sm:$0xff]  ;;  %v1974_v36 = vld [vmem:[%s1725_s8 + $0xc4] sm:$0xff] }
  0x2f   : > { %v1162_v60 = vmax.f32 %v1126_v11, 0.0  ;;  %v1097_v14 = vadd.f32 %v1061_v62, %v988_v32  ;;  %v1043_v25 = vmul.f32 %v1768_v23, %v1006_v47  ;;  %v393_v8 = vadd.f32 %v357_v15, %v284_v46  ;;  %v1965_v44 = vld [vmem:[%s1725_s8 + $0xb2] sm:$0xff]  ;;  %v266_v58 = vld [vmem:[%s1725_s8 + $0xe8] sm:$0xff] }
  0x30   : > { %v541_v31 = vmul.f32 %v1720_v4, %v1941_v0  ;;  %v650_v37 = vmul.f32 %v1730_v5, %v613_v9  ;;  %v997_v35 = vadd.f32 %v961_v41, %v888_v22  ;;  %v677_v39 = vadd.f32 %v641_v54, %v568_v52  ;;  %v623_v32 = vld [vmem:[%s1725_s8 + $0xb3] sm:$0xff]  ;;  %v1025_v22 = vld [vmem:[%s1725_s8 + $0xc6] sm:$0xff] }
  0x31   : > { %1575 = vmatmul.msk.f32.vlgmr.msra.gmra.mxu1 %vm1192_vm1, %v1162_v60  ;;  %v1136_v62 = vadd.f32 %v1854_v49, %v1097_v14  ;;  %v759_v59 = vmul.f32 %v1735_v6, %v722_v34  ;;  %v834_v43 = vmul.f32 %v1740_v7, %v1948_v16  ;;  %v502_v45 = vadd.f32 %v466_v20, %v393_v8  ;;  %v916_v34 = vld [vmem:[%s1725_s8 + $0xc5] sm:$0xff]  ;;  %v1992_v8 = vld [vmem:[%s1725_s8 + $0xfa] sm:$0xff] }
  0x32   : > { %v294_v51 = vmul.f32 %v1705_v1, %v257_v28  ;;  %v367_v11 = vmul.f32 %v1710_v2, %v330_v10  ;;  %v1106_v27 = vadd.f32 %v1070_v19, %v997_v35  ;;  %v786_v41 = vadd.f32 %v750_v56, %v677_v39  ;;  %v339_v56 = vld [vmem:[%s1725_s8 + $0xe9] sm:$0xff] }
  0x33   : > { %v1172_v30 = vmax.f32 %v1136_v62, 0.0  ;;  %v943_v54 = vmul.f32 %v1759_v18, %v906_v26  ;;  %v476_v47 = vmul.f32 %v1715_v3, %v1748_v13  ;;  %v577_v46 = vadd.f32 %v541_v31, %v502_v45  ;;  %v632_v31 = vld [vmem:[%s1725_s8 + $0xfb] sm:$0xff]  ;;  %v1999_v39 = vld [vmem:[%s1725_s8 + $0x10c] sm:$0xff] }
  0x34   : > { %v1052_v9 = vmul.f32 %v1768_v23, %v1015_v48  ;;  %v403_v60 = vadd.f32 %v367_v11, %v294_v51  ;;  %v551_v19 = vmul.f32 %v1720_v4, %v1965_v44  ;;  %v1145_v14 = vadd.f32 %v1854_v49, %v1106_v27  ;;  %v239_v51 = vld [vmem:[%s1725_s8 + $0x10] sm:$0xff] }
  0x35   : > { %1585 = vmatmul.msk.f32.gmra.mxu2 %vm1192_vm1, %v1172_v30  ;;  %v861_v15 = vadd.f32 %v825_v63, %v786_v41  ;;  %v660_v13 = vmul.f32 %v1730_v5, %v623_v32  ;;  %v769_v20 = vmul.f32 %v1735_v6, %v1754_v17  ;;  %v686_v52 = vadd.f32 %v650_v37, %v577_v46  ;;  %v312_v11 = vld [vmem:[%s1725_s8 + $0x11] sm:$0xff] }
  0x36   : > { %v512_v28 = vadd.f32 %v476_v47, %v403_v60  ;;  %v844_v10 = vmul.f32 %v1740_v7, %v1974_v36  ;;  %v303_v62 = vmul.f32 %v1705_v1, %v266_v58  ;;  %v1181_v63 = vmax.f32 %v1145_v14, 0.0  ;;  %v2015_v60 = vld [vmem:[%s1725_s8 + $0x22] sm:$0xff] }
  0x37   : > { %v970_v26 = vadd.f32 %v934_v50, %v861_v15  ;;  %v376_v35 = vmul.f32 %v1710_v2, %v339_v56  ;;  %v485_v17 = vmul.f32 %v1715_v3, %v1780_v33  ;;  %v795_v37 = vadd.f32 %v759_v59, %v686_v52  ;;  %v925_v59 = vld [vmem:[%s1725_s8 + $0x10d] sm:$0xff] }
  0x38   : > { %v587_v48 = vadd.f32 %v551_v19, %v512_v28  ;;  %v953_v30 = vmul.f32 %v1759_v18, %v916_v34  ;;  %v1062_v45 = vmul.f32 %v1768_v23, %v1025_v22  ;;  %1594 = vmatmul.msk.f32.gmra.mxu3 %vm1192_vm1, %v1181_v63  ;;  %v560_v33 = vmul.f32 %v1720_v4, %v1992_v8  ;;  %v1034_v56 = vld [vmem:[%s1725_s8 + $0x10e] sm:$0xff] }
  0x39   : > { %v1079_v50 = vadd.f32 %v1043_v25, %v970_v26  ;;  %v412_v32 = vadd.f32 %v376_v35, %v303_v62  ;;  %v669_v27 = vmul.f32 %v1730_v5, %v632_v31  ;;  %v870_v41 = vadd.f32 %v834_v43, %v795_v37  ;;  %v605_v43 = vld [vmem:[%s1725_s8 + $0x23] sm:$0xff]  ;;  %v2026_v52 = vld [vmem:[%s1725_s8 + $0x34] sm:$0xff] }
  0x3a   : > { %v696_v47 = vadd.f32 %v660_v13, %v587_v48  ;;  %v778_v58 = vmul.f32 %v1735_v6, %v1792_v40  ;;  %v853_v46 = vmul.f32 %v1740_v7, %v1999_v39  ;;  %v276_v14 = vmul.f32 %v1705_v1, %v239_v51  ;;  %v248_v26 = vld [vmem:[%s1725_s8 + $0x58] sm:$0xff] }
  0x3b   : > { %v1118_v25 = vadd.f32 %v1854_v49, %v1079_v50  ;;  %v521_v19 = vadd.f32 %v485_v17, %v412_v32  ;;  %v349_v15 = vmul.f32 %v1710_v2, %v312_v11  ;;  %v979_v13 = vadd.f32 %v943_v54, %v870_v41  ;;  %v321_v35 = vld [vmem:[%s1725_s8 + $0x59] sm:$0xff]  ;;  %v2041_v32 = vld [vmem:[%s1725_s8 + $0x6a] sm:$0xff] }
  0x3c   : > { %v805_v34 = vadd.f32 %v769_v20, %v696_v47  ;;  %v962_v40 = vmul.f32 %v1759_v18, %v925_v59  ;;  %v458_v22 = vmul.f32 %v1715_v3, %v1806_v53  ;;  %v533_v63 = vmul.f32 %v1720_v4, %v2015_v60  ;;  %v898_v53 = vld [vmem:[%s1725_s8 + $0x35] sm:$0xff] }
  0x3d   : > { %v1154_v28 = vmax.f32 %v1118_v25, 0.0  ;;  %v596_v62 = vadd.f32 %v560_v33, %v521_v19  ;;  %v385_v31 = vadd.f32 %v349_v15, %v276_v14  ;;  %v1088_v17 = vadd.f32 %v1052_v9, %v979_v13  ;;  %v1007_v33 = vld [vmem:[%s1725_s8 + $0x36] sm:$0xff]  ;;  %v258_v13 = vld [vmem:[%s1725_s8 + $0xa8] sm:$0xff] }
  0x3e   : > { %v880_v54 = vadd.f32 %v844_v10, %v805_v34  ;;  %v1071_v20 = vmul.f32 %v1768_v23, %v1034_v56  ;;  %v642_v37 = vmul.f32 %v1730_v5, %v605_v43  ;;  %v751_v11 = vmul.f32 %v1735_v6, %v1816_v61  ;;  %v2052_v56 = vld [vmem:[%s1725_s8 + $0x7c] sm:$0xff]  ;;  %v331_v34 = vld [vmem:[%s1725_s8 + $0xa9] sm:$0xff] }
  0x3f   : > { %1567 = vmatmul.msk.f32.gmra.mxu0 %vm1192_vm1, %v1154_v28  ;;  %v705_v48 = vadd.f32 %v669_v27, %v596_v62  ;;  %v494_v51 = vadd.f32 %v458_v22, %v385_v31  ;;  %v826_v50 = vmul.f32 %v1740_v7, %v2026_v52  ;;  %v1127_v9 = vadd.f32 %v1854_v49, %v1088_v17  ;;  %v614_v27 = vld [vmem:[%s1725_s8 + $0x6b] sm:$0xff] }
  0x40   : > { %v989_v10 = vadd.f32 %v953_v30, %v880_v54  ;;  %v285_v59 = vmul.f32 %v1705_v1, %v248_v26  ;;  %v358_v41 = vmul.f32 %v1710_v2, %v321_v35  ;;  %v935_v61 = vmul.f32 %v1759_v18, %v898_v53  ;;  %v1016_v54 = vld [vmem:[%s1725_s8 + $0x7e] sm:$0xff] }
  0x41   : > { %v814_v47 = vadd.f32 %v778_v58, %v705_v48  ;;  %v569_v25 = vadd.f32 %v533_v63, %v494_v51  ;;  %v467_v19 = vmul.f32 %v1715_v3, %v1831_v21  ;;  %v1163_v14 = vmax.f32 %v1127_v9, 0.0  ;;  %v907_v21 = vld [vmem:[%s1725_s8 + $0x7d] sm:$0xff] }
  0x42   : > { %v1098_v15 = vadd.f32 %v1062_v45, %v989_v10  ;;  %v394_v30 = vadd.f32 %v358_v41, %v285_v59  ;;  %v542_v43 = vmul.f32 %v1720_v4, %v2041_v32  ;;  %v1044_v28 = vmul.f32 %v1768_v23, %v1007_v33  ;;  %v624_v48 = vld [vmem:[%s1725_s8 + $0xbb] sm:$0xff]  ;;  %v2078_v33 = vld [vmem:[%s1725_s8 + $0xcc] sm:$0xff] }
  0x43   : > { %v889_v22 = vadd.f32 %v853_v46, %v814_v47  ;;  %v678_v58 = vadd.f32 %v642_v37, %v569_v25  ;;  %v651_v62 = vmul.f32 %v1730_v5, %v614_v27  ;;  %1576 = vmatmul.msk.f32.gmra.mxu1 %vm1192_vm1, %v1163_v14  ;;  %v760_v63 = vmul.f32 %v1735_v6, %v1839_v29  ;;  %v2068_v46 = vld [vmem:[%s1725_s8 + $0xba] sm:$0xff]  ;;  %v267_v27 = vld [vmem:[%s1725_s8 + $0xf0] sm:$0xff] }
  0x44   : > { %v1137_v45 = vadd.f32 %v1854_v49, %v1098_v15  ;;  %v503_v31 = vadd.f32 %v467_v19, %v394_v30  ;;  %v835_v26 = vmul.f32 %v1740_v7, %v2052_v56  ;;  %v295_v37 = vmul.f32 %v1705_v1, %v258_v13  ;;  %v340_v47 = vld [vmem:[%s1725_s8 + $0xf1] sm:$0xff] }
  0x45   : > { %v998_v35 = vadd.f32 %v962_v40, %v889_v22  ;;  %v787_v17 = vadd.f32 %v751_v11, %v678_v58  ;;  %v368_v53 = vmul.f32 %v1710_v2, %v331_v34  ;;  %v944_v29 = vmul.f32 %v1759_v18, %v907_v21  ;;  %v917_v14 = vld [vmem:[%s1725_s8 + $0xcd] sm:$0xff]  ;;  %v2095_v34 = vld [vmem:[%s1725_s8 + $0x102] sm:$0xff] }
  0x46   : > { %v1173_v51 = vmax.f32 %v1137_v45, 0.0  ;;  %v578_v9 = vadd.f32 %v542_v43, %v503_v31  ;;  %v477_v10 = vmul.f32 %v1715_v3, %v1860_v55  ;;  %v552_v41 = vmul.f32 %v1720_v4, %v2068_v46  ;;  %v1026_v13 = vld [vmem:[%s1725_s8 + $0xce] sm:$0xff]  ;;  %v633_v21 = vld [vmem:[%s1725_s8 + $0x103] sm:$0xff] }
  0x47   : > { %v1107_v59 = vadd.f32 %v1071_v20, %v998_v35  ;;  %v862_v40 = vadd.f32 %v826_v50, %v787_v17  ;;  %v404_v11 = vadd.f32 %v368_v53, %v295_v37  ;;  %v1053_v19 = vmul.f32 %v1768_v23, %v1016_v54  ;;  %v2104_v17 = vld [vmem:[%s1725_s8 + $0x114] sm:$0xff] }
  0x48   : > { %1586 = vmatmul.msk.f32.gmra.mxu2 %vm1192_vm1, %v1173_v51  ;;  %v687_v25 = vadd.f32 %v651_v62, %v578_v9  ;;  %v661_v55 = vmul.f32 %v1730_v5, %v624_v48  ;;  %v770_v20 = vmul.f32 %v1735_v6, %v1870_v12  ;;  %v845_v43 = vmul.f32 %v1740_v7, %v2078_v33  ;;  %v240_v54 = vld [vmem:[%s1725_s8 + $0x18] sm:$0xff] }
  0x49   : > { %v1146_v50 = vadd.f32 %v1854_v49, %v1107_v59  ;;  %v971_v15 = vadd.f32 %v935_v61, %v862_v40  ;;  %v513_v30 = vadd.f32 %v477_v10, %v404_v11  ;;  %v304_v58 = vmul.f32 %v1705_v1, %v267_v27  ;;  %v313_v48 = vld [vmem:[%s1725_s8 + $0x19] sm:$0xff] }
  0x4a   : > { %v796_v22 = vadd.f32 %v760_v63, %v687_v25  ;;  %v377_v62 = vmul.f32 %v1710_v2, %v340_v47  ;;  %v486_v12 = vmul.f32 %v1715_v3, %v1884_v38  ;;  %v954_v35 = vmul.f32 %v1759_v18, %v917_v14  ;;  %v926_v10 = vld [vmem:[%s1725_s8 + $0x115] sm:$0xff]  ;;  %v2122_v47 = vld [vmem:[%s1725_s8 + $0x2a] sm:$0xff] }
  0x4b   : > { %v1182_v45 = vmax.f32 %v1146_v50, 0.0  ;;  %v1080_v61 = vadd.f32 %v1044_v28, %v971_v15  ;;  %v588_v31 = vadd.f32 %v552_v41, %v513_v30  ;;  %v1063_v63 = vmul.f32 %v1768_v23, %v1026_v13  ;;  %v1035_v59 = vld [vmem:[%s1725_s8 + $0x116] sm:$0xff]  ;;  %v606_v25 = vld [vmem:[%s1725_s8 + $0x2b] sm:$0xff] }
  0x4c   : > { %v871_v37 = vadd.f32 %v835_v26, %v796_v22  ;;  %v413_v53 = vadd.f32 %v377_v62, %v304_v58  ;;  %v561_v38 = vmul.f32 %v1720_v4, %v2095_v34  ;;  %v670_v9 = vmul.f32 %v1730_v5, %v633_v21  ;;  %v2129_v15 = vld [vmem:[%s1725_s8 + $0x3c] sm:$0xff] }
  0x4d   : > { %1595 = vmatmul.msk.f32.gmra.mxu3 %vm1192_vm1, %v1182_v45  ;;  %v1119_v28 = vadd.f32 %v1854_v49, %v1080_v61  ;;  %v697_v51 = vadd.f32 %v661_v55, %v588_v31  ;;  %v779_v26 = vmul.f32 %v1735_v6, %v1899_v57  ;;  %v854_v41 = vmul.f32 %v1740_v7, %v2104_v17  ;;  %v249_v58 = vld [vmem:[%s1725_s8 + $0x60] sm:$0xff] }
  0x4e   : > { %v980_v40 = vadd.f32 %v944_v29, %v871_v37  ;;  %v522_v11 = vadd.f32 %v486_v12, %v413_v53  ;;  %v277_v27 = vmul.f32 %v1705_v1, %v240_v54  ;;  %v350_v50 = vmul.f32 %v1710_v2, %v313_v48  ;;  %v322_v62 = vld [vmem:[%s1725_s8 + $0x61] sm:$0xff]  ;;  %v2146_v37 = vld [vmem:[%s1725_s8 + $0x72] sm:$0xff] }
  0x4f   : > { %v1155_v55 = vmax.f32 %v1119_v28, 0.0  ;;  %v806_v14 = vadd.f32 %v770_v20, %v697_v51  ;;  %v459_v57 = vmul.f32 %v1715_v3, %v1913_v24  ;;  %v963_v13 = vmul.f32 %v1759_v18, %v926_v10  ;;  %v615_v51 = vld [vmem:[%s1725_s8 + $0x73] sm:$0xff] }
  0x50   : > { %v1089_v29 = vadd.f32 %v1053_v19, %v980_v40  ;;  %v597_v30 = vadd.f32 %v561_v38, %v522_v11  ;;  %v1072_v22 = vmul.f32 %v1768_v23, %v1035_v59  ;;  %v386_v12 = vadd.f32 %v350_v50, %v277_v27  ;;  %v899_v19 = vld [vmem:[%s1725_s8 + $0x3d] sm:$0xff] }
  0x51   : > { %1568 = vmatmul.msk.f32.gmra.mxu0 %vm1192_vm1, %v1155_v55  ;;  %v881_v20 = vadd.f32 %v845_v43, %v806_v14  ;;  %v534_v24 = vmul.f32 %v1720_v4, %v2122_v47  ;;  %v643_v21 = vmul.f32 %v1730_v5, %v606_v25  ;;  %v752_v31 = vmul.f32 %v1735_v6, %v1923_v42  ;;  %v1008_v38 = vld [vmem:[%s1725_s8 + $0x3e] sm:$0xff]  ;;  %v259_v55 = vld [vmem:[%s1725_s8 + $0xb0] sm:$0xff] }
  0x52   : > { %v1128_v45 = vadd.f32 %v1854_v49, %v1089_v29  ;;  %v706_v61 = vadd.f32 %v670_v9, %v597_v30  ;;  %v827_v54 = vmul.f32 %v1740_v7, %v2129_v15  ;;  %v495_v53 = vadd.f32 %v459_v57, %v386_v12  ;;  %v2156_v40 = vld [vmem:[%s1725_s8 + $0x84] sm:$0xff]  ;;  %v332_v14 = vld [vmem:[%s1725_s8 + $0xb1] sm:$0xff] }
  0x53   : > { %v990_v43 = vadd.f32 %v954_v35, %v881_v20  ;;  %v286_v48 = vmul.f32 %v1705_v1, %v249_v58  ;;  %v359_v28 = vmul.f32 %v1710_v2, %v322_v62  ;;  %v936_v42 = vmul.f32 %v1759_v18, %v899_v19  ;;  %v908_v57 = vld [vmem:[%s1725_s8 + $0x85] sm:$0xff] }
  0x54   : > { %v1164_v10 = vmax.f32 %v1128_v45, 0.0  ;;  %v815_v9 = vadd.f32 %v779_v26, %v706_v61  ;;  %v468_v59 = vmul.f32 %v1715_v3, %v1941_v0  ;;  %v570_v35 = vadd.f32 %v534_v24, %v495_v53  ;;  %v1017_v20 = vld [vmem:[%s1725_s8 + $0x86] sm:$0xff] }
  0x55   : > { %v1099_v11 = vadd.f32 %v1063_v63, %v990_v43  ;;  %v395_v27 = vadd.f32 %v359_v28, %v286_v48  ;;  %v543_v25 = vmul.f32 %v1720_v4, %v2146_v37  ;;  %v1045_v50 = vmul.f32 %v1768_v23, %v1008_v38  ;;  %v2173_v12 = vld [vmem:[%s1725_s8 + $0xc2] sm:$0xff]  ;;  %v2182_v38 = vld [vmem:[%s1725_s8 + $0xd4] sm:$0xff] }
  0x56   : > { %1577 = vmatmul.msk.f32.gmra.mxu1 %vm1192_vm1, %v1164_v10  ;;  %v890_v26 = vadd.f32 %v854_v41, %v815_v9  ;;  %v652_v0 = vmul.f32 %v1730_v5, %v615_v51  ;;  %v761_v63 = vmul.f32 %v1735_v6, %v1948_v16  ;;  %v679_v30 = vadd.f32 %v643_v21, %v570_v35  ;;  %v625_v45 = vld [vmem:[%s1725_s8 + $0xc3] sm:$0xff]  ;;  %v268_v48 = vld [vmem:[%s1725_s8 + $0xf8] sm:$0xff] }
  0x57   : > { %v1138_v29 = vadd.f32 %v1854_v49, %v1099_v11  ;;  %v504_v58 = vadd.f32 %v468_v59, %v395_v27  ;;  %v836_v62 = vmul.f32 %v1740_v7, %v2156_v40  ;;  %v296_v24 = vmul.f32 %v1705_v1, %v259_v55  ;;  %v1027_v35 = vld [vmem:[%s1725_s8 + $0xd6] sm:$0xff] }
  0x58   : > { %v999_v41 = vadd.f32 %v963_v13, %v890_v26  ;;  %v369_v19 = vmul.f32 %v1710_v2, %v332_v14  ;;  %v478_v16 = vmul.f32 %v1715_v3, %v1965_v44  ;;  %v788_v21 = vadd.f32 %v752_v31, %v679_v30  ;;  %v341_v44 = vld [vmem:[%s1725_s8 + $0xf9] sm:$0xff]  ;;  %v2200_v26 = vld [vmem:[%s1725_s8 + $0x10a] sm:$0xff] }
  0x59   : > { %v1174_v61 = vmax.f32 %v1138_v29, 0.0  ;;  %v579_v43 = vadd.f32 %v543_v25, %v504_v58  ;;  %v945_v53 = vmul.f32 %v1759_v18, %v908_v57  ;;  %v1054_v13 = vmul.f32 %v1768_v23, %v1017_v20  ;;  %v634_v29 = vld [vmem:[%s1725_s8 + $0x10b] sm:$0xff]  ;;  %v2207_v30 = vld [vmem:[%s1725_s8 + $0x11c] sm:$0xff] }
  0x5a   : > { %v1108_v28 = vadd.f32 %v1072_v22, %v999_v41  ;;  %v405_v51 = vadd.f32 %v369_v19, %v296_v24  ;;  %v553_v10 = vmul.f32 %v1720_v4, %v2173_v12  ;;  %v863_v31 = vadd.f32 %v827_v54, %v788_v21  ;;  %v918_v22 = vld [vmem:[%s1725_s8 + $0xd5] sm:$0xff]  ;;  %v241_v19 = vld [vmem:[%s1725_s8 + $0x20] sm:$0xff] }
  0x5b   : > { %1587 = vmatmul.msk.f32.gmra.mxu2 %vm1192_vm1, %v1174_v61  ;;  %v688_v9 = vadd.f32 %v652_v0, %v579_v43  ;;  %v662_v59 = vmul.f32 %v1730_v5, %v625_v45  ;;  %v771_v11 = vmul.f32 %v1735_v6, %v1974_v36  ;;  %v846_v55 = vmul.f32 %v1740_v7, %v2182_v38  ;;  %v314_v61 = vld [vmem:[%s1725_s8 + $0x21] sm:$0xff] }
  0x5c   : > { %v1147_v27 = vadd.f32 %v1854_v49, %v1108_v28  ;;  %v514_v25 = vadd.f32 %v478_v16, %v405_v51  ;;  %v305_v14 = vmul.f32 %v1705_v1, %v268_v48  ;;  %v972_v54 = vadd.f32 %v936_v42, %v863_v31  ;;  %v2226_v31 = vld [vmem:[%s1725_s8 + $0x32] sm:$0xff] }
  0x5d   : > { %v797_v0 = vadd.f32 %v761_v63, %v688_v9  ;;  %v378_v57 = vmul.f32 %v1710_v2, %v341_v44  ;;  %v487_v36 = vmul.f32 %v1715_v3, %v1992_v8  ;;  %v955_v41 = vmul.f32 %v1759_v18, %v918_v22  ;;  %v927_v8 = vld [vmem:[%s1725_s8 + $0x11d] sm:$0xff]  ;;  %v607_v9 = vld [vmem:[%s1725_s8 + $0x33] sm:$0xff] }
  0x5e   : > { %v1183_v58 = vmax.f32 %v1147_v27, 0.0  ;;  %v589_v20 = vadd.f32 %v553_v10, %v514_v25  ;;  %v1064_v24 = vmul.f32 %v1768_v23, %v1027_v35  ;;  %v1081_v16 = vadd.f32 %v1045_v50, %v972_v54  ;;  %v2234_v27 = vld [vmem:[%s1725_s8 + $0x44] sm:$0xff] }
  0x5f   : > { %v872_v42 = vadd.f32 %v836_v62, %v797_v0  ;;  %v414_v63 = vadd.f32 %v378_v57, %v305_v14  ;;  %v562_v45 = vmul.f32 %v1720_v4, %v2200_v26  ;;  %v671_v43 = vmul.f32 %v1730_v5, %v634_v29  ;;  %v1036_v62 = vld [vmem:[%s1725_s8 + $0x11e] sm:$0xff]  ;;  %v250_v54 = vld [vmem:[%s1725_s8 + $0x68] sm:$0xff] }
  0x60   : > { %1596 = vmatmul.msk.f32.gmra.mxu3 %vm1192_vm1, %v1183_v58  ;;  %v698_v21 = vadd.f32 %v662_v59, %v589_v20  ;;  %v780_v48 = vmul.f32 %v1735_v6, %v1999_v39  ;;  %v855_v50 = vmul.f32 %v1740_v7, %v2207_v30  ;;  %v1120_v28 = vadd.f32 %v1854_v49, %v1081_v16  ;;  %v323_v0 = vld [vmem:[%s1725_s8 + $0x69] sm:$0xff]  ;;  %v2252_v29 = vld [vmem:[%s1725_s8 + $0x7a] sm:$0xff] }
  0x61   : > { %v981_v51 = vadd.f32 %v945_v53, %v872_v42  ;;  %v523_v10 = vadd.f32 %v487_v36, %v414_v63  ;;  %v278_v44 = vmul.f32 %v1705_v1, %v241_v19  ;;  %v964_v22 = vmul.f32 %v1759_v18, %v927_v8  ;;  %v1009_v20 = vld [vmem:[%s1725_s8 + $0x46] sm:$0xff]  ;;  %v2272_v63 = vld [vmem:[%s2827_s1 + $0x2] ss:$0 sm:$0xff] }
  0x62   : > { %v807_v59 = vadd.f32 %v771_v11, %v698_v21  ;;  %v351_v39 = vmul.f32 %v1710_v2, %v314_v61  ;;  %v460_v35 = vmul.f32 %v1715_v3, %v2015_v60  ;;  %v1156_v25 = vmax.f32 %v1120_v28, 0.0  ;;  %v900_v60 = vld [vmem:[%s1725_s8 + $0x45] sm:$0xff]  ;;  %v333_v28 = vld [vmem:[%s1725_s8 + $0xb9] sm:$0xff] }
  0x63   : > { %v1090_v53 = vadd.f32 %v1054_v13, %v981_v51  ;;  %v598_v14 = vadd.f32 %v562_v45, %v523_v10  ;;  %v2237_v1 = vmul.f32 %v1768_v23, %v1036_v62  ;;  %v535_v2 = vmul.f32 %v1720_v4, %v2226_v31  ;;  %v2277_v8 = vld [vmem:[%s1725_s8 + $0x8c] sm:$0xff]  ;;  %v260_v62 = vld [vmem:[%s1725_s8 + $0xb8] sm:$0xff]  ;;  %v2298_v10 = vld [vmem:[%s2827_s1 + $0x4] ss:$0 sm:$0xff] }
  0x64   : > { %v882_v11 = vadd.f32 %v846_v55, %v807_v59  ;;  %v387_v57 = vadd.f32 %v351_v39, %v278_v44  ;;  %v644_v3 = vmul.f32 %v1730_v5, %v607_v9  ;;  %1569 = vmatmul.msk.f32.gmra.mxu0 %vm1192_vm1, %v1156_v25  ;;  %v753_v23 = vmul.f32 %v1735_v6, %v2026_v52  ;;  %v2258_v5 = vld [vmem:[%s2827_s1] ss:$0 sm:$0xff]  ;;  %v2264_v6 = vld [vmem:[%s2827_s1 + $0x1] ss:$0 sm:$0xff]  ;;  %v2304_v9 = vld [vmem:[%s2827_s1 + $0x5] ss:$0 sm:$0xff] }
  0x65   : > { %v1129_v13 = vadd.f32 %v1854_v49, %v1090_v53  ;;  %v707_v36 = vadd.f32 %v671_v43, %v598_v14  ;;  %v828_v55 = vmul.f32 %v1740_v7, %v2234_v27  ;;  %v287_v19 = vmul.f32 %v2258_v5, %v250_v54  ;;  %v616_v52 = vld [vmem:[%s1725_s8 + $0x7b] sm:$0xff]  ;;  %v909_v59 = vld [vmem:[%s1725_s8 + $0x8d] sm:$0xff]  ;;  %v2313_v53 = vld [vmem:[%s2827_s1 + $0x6] ss:$0 sm:$0xff] }
  0x66   : > { %v991_v58 = vadd.f32 %v955_v41, %v882_v11  ;;  %v496_v4 = vadd.f32 %v460_v35, %v387_v57  ;;  %v360_v7 = vmul.f32 %v2264_v6, %v323_v0  ;;  %v937_v42 = vmul.f32 %v1759_v18, %v900_v60  ;;  %v1018_v54 = vld [vmem:[%s1725_s8 + $0x8e] sm:$0xff] }
  0x67   : > { %v1165_v41 = vmax.f32 %v1129_v13, 0.0  ;;  %v816_v16 = vadd.f32 %v780_v48, %v707_v36  ;;  %v469_v45 = vmul.f32 %v2272_v63, %v2041_v32  ;;  %v2282_v48 = vld [vmem:[%s2827_s1 + $0x3] ss:$0 sm:$0xff]  ;;  %v653_v44 = vmul.f32 %v2298_v10, %v616_v52  ;;  %v2319_v0 = vld [vmem:[%s1725_s8 + $0xca] sm:$0xff] }
  0x68   : > { %v1100_v61 = vadd.f32 %v1064_v24, %v991_v58  ;;  %v571_v21 = vadd.f32 %v535_v2, %v496_v4  ;;  %v396_v43 = vadd.f32 %v360_v7, %v287_v19  ;;  %v544_v18 = vmul.f32 %v2282_v48, %v2252_v29  ;;  %v2292_v24 = vld [vmem:[%s2827_s1 + $0x8] ss:$0 sm:$0xff]  ;;  %v2329_v58 = vld [vmem:[%s2827_s1 + $0x7] ss:$0 sm:$0xff]  ;;  %v2333_v4 = vld [vmem:[%s1725_s8 + $0xdc] sm:$0xff] }
  0x69   : > { %1578 = vmatmul.msk.f32.gmra.mxu1 %vm1192_vm1, %v1165_v41  ;;  %v891_v32 = vadd.f32 %v855_v50, %v816_v16  ;;  %v1046_v51 = vmul.f32 %v2292_v24, %v1009_v20  ;;  %v762_v50 = vmul.f32 %v2304_v9, %v2052_v56  ;;  %v837_v14 = vmul.f32 %v2313_v53, %v2277_v8  ;;  %v269_v20 = vld [vmem:[%s1725_s8 + $0x100] sm:$0xff] }
  0x6a   : > { %v1139_v39 = vadd.f32 %v1854_v49, %v1100_v61  ;;  %v680_v35 = vadd.f32 %v644_v3, %v571_v21  ;;  %v505_v25 = vadd.f32 %v469_v45, %v396_v43  ;;  %v297_v56 = vmul.f32 %v2258_v5, %v260_v62  ;;  %v626_v3 = vld [vmem:[%s1725_s8 + $0xcb] sm:$0xff]  ;;  %v342_v52 = vld [vmem:[%s1725_s8 + $0x101] sm:$0xff] }
  0x6b   : > { %v1000_v11 = vadd.f32 %v964_v22, %v891_v32  ;;  %v370_v57 = vmul.f32 %v2264_v6, %v333_v28  ;;  %v479_v2 = vmul.f32 %v2272_v63, %v2068_v46  ;;  %v946_v22 = vmul.f32 %v2329_v58, %v909_v59  ;;  %v1028_v21 = vld [vmem:[%s1725_s8 + $0xde] sm:$0xff]  ;;  %v2352_v32 = vld [vmem:[%s1725_s8 + $0x112] sm:$0xff] }
  0x6c   : > { %v1175_v60 = vmax.f32 %v1139_v39, 0.0  ;;  %v789_v13 = vadd.f32 %v753_v23, %v680_v35  ;;  %v580_v36 = vadd.f32 %v544_v18, %v505_v25  ;;  %v1055_v46 = vmul.f32 %v2292_v24, %v1018_v54  ;;  %v635_v39 = vld [vmem:[%s1725_s8 + $0x113] sm:$0xff]  ;;  %v2359_v35 = vld [vmem:[%s1725_s8 + $0x124] sm:$0xff] }
  0x6d   : > { %v1109_v19 = vadd.f32 %v2237_v1, %v1000_v11  ;;  %v406_v7 = vadd.f32 %v370_v57, %v297_v56  ;;  %v554_v23 = vmul.f32 %v2282_v48, %v2319_v0  ;;  %v663_v45 = vmul.f32 %v2298_v10, %v626_v3  ;;  %v919_v1 = vld [vmem:[%s1725_s8 + $0xdd] sm:$0xff]  ;;  %v242_v57 = vld [vmem:[%s1725_s8 + $0x28] sm:$0xff] }
  0x6e   : > { %1588 = vmatmul.msk.f32.gmra.mxu2 %vm1192_vm1, %v1175_v60  ;;  %v864_v41 = vadd.f32 %v828_v55, %v789_v13  ;;  %v689_v16 = vadd.f32 %v653_v44, %v580_v36  ;;  %v772_v61 = vmul.f32 %v2304_v9, %v2078_v33  ;;  %v847_v62 = vmul.f32 %v2313_v53, %v2333_v4  ;;  %v315_v60 = vld [vmem:[%s1725_s8 + $0x29] sm:$0xff] }
  0x6f   : > { %v1148_v43 = vadd.f32 %v1854_v49, %v1109_v19  ;;  %v515_v18 = vadd.f32 %v479_v2, %v406_v7  ;;  %v306_v28 = vmul.f32 %v2258_v5, %v269_v20  ;;  %v379_v59 = vmul.f32 %v2264_v6, %v342_v52 }
  0x70   : > { %v973_v55 = vadd.f32 %v937_v42, %v864_v41  ;;  %v798_v44 = vadd.f32 %v762_v50, %v689_v16  ;;  %v488_v33 = vmul.f32 %v2272_v63, %v2095_v34  ;;  %v956_v11 = vmul.f32 %v2329_v58, %v919_v1  ;;  %v928_v34 = vld [vmem:[%s1725_s8 + $0x125] sm:$0xff]  ;;  %v2378_v41 = vld [vmem:[%s1725_s8 + $0x3a] sm:$0xff] }
  0x71   : > { %v1184_v25 = vmax.f32 %v1148_v43, 0.0  ;;  %v590_v54 = vadd.f32 %v554_v23, %v515_v18  ;;  %v1065_v56 = vmul.f32 %v2292_v24, %v1028_v21  ;;  %v415_v50 = vadd.f32 %v379_v59, %v306_v28  ;;  %v608_v16 = vld [vmem:[%s1725_s8 + $0x3b] sm:$0xff]  ;;  %v2386_v43 = vld [vmem:[%s1725_s8 + $0x4c] sm:$0xff] }
  0x72   : > { %v1082_v2 = vadd.f32 %v1046_v51, %v973_v55  ;;  %v873_v42 = vadd.f32 %v837_v14, %v798_v44  ;;  %v563_v3 = vmul.f32 %v2282_v48, %v2352_v32  ;;  %v672_v36 = vmul.f32 %v2298_v10, %v635_v39  ;;  %v1037_v14 = vld [vmem:[%s1725_s8 + $0x126] sm:$0xff]  ;;  %v251_v55 = vld [vmem:[%s1725_s8 + $0x70] sm:$0xff] }
  0x73   : > { %1597 = vmatmul.msk.f32.gmra.mxu3 %vm1192_vm1, %v1184_v25  ;;  %v699_v13 = vadd.f32 %v663_v45, %v590_v54  ;;  %v781_v20 = vmul.f32 %v2304_v9, %v2104_v17  ;;  %v856_v51 = vmul.f32 %v2313_v53, %v2359_v35  ;;  %v524_v23 = vadd.f32 %v488_v33, %v415_v50  ;;  %v324_v44 = vld [vmem:[%s1725_s8 + $0x71] sm:$0xff] }
  0x74   : > { %v1121_v19 = vadd.f32 %v1854_v49, %v1082_v2  ;;  %v982_v7 = vadd.f32 %v946_v22, %v873_v42  ;;  %v279_v52 = vmul.f32 %v2258_v5, %v242_v57  ;;  %v965_v1 = vmul.f32 %v2329_v58, %v928_v34  ;;  %v2407_v2 = vld [vmem:[%s1725_s8 + $0x82] sm:$0xff] }
  0x75   : > { %v808_v45 = vadd.f32 %v772_v61, %v699_v13  ;;  %v352_v17 = vmul.f32 %v2264_v6, %v315_v60  ;;  %v461_v21 = vmul.f32 %v2272_v63, %v2122_v47  ;;  %v599_v22 = vadd.f32 %v563_v3, %v524_v23  ;;  %v901_v47 = vld [vmem:[%s1725_s8 + $0x4d] sm:$0xff]  ;;  %v617_v13 = vld [vmem:[%s1725_s8 + $0x83] sm:$0xff] }
  0x76   : > { %v1157_v49 = vmax.f32 %v1121_v19, 0.0  ;;  %v1091_v18 = vadd.f32 %v1055_v46, %v982_v7  ;;  %v1074_v28 = vmul.f32 %v2292_v24, %v1037_v14  ;;  %v536_v33 = vmul.f32 %v2282_v48, %v2378_v41  ;;  %v2399_v46 = vld [vmem:[%s2828_s2] ss:$0 sm:$0xff]  ;;  %v1010_v3 = vld [vmem:[%s1725_s8 + $0x4e] sm:$0xff] }
  0x77   : > { %v883_v59 = vadd.f32 %v847_v62, %v808_v45  ;;  %v388_v61 = vadd.f32 %v352_v17, %v279_v52  ;;  %v645_v39 = vmul.f32 %v2298_v10, %v608_v16  ;;  %v708_v54 = vadd.f32 %v672_v36, %v599_v22  ;;  %v2417_v7 = vld [vmem:[%s1725_s8 + $0x94] sm:$0xff]  ;;  %v261_v45 = vld [vmem:[%s1725_s8 + $0xc0] sm:$0xff] }
  0x78   : > { %1570 = vmatmul.msk.f32.gmra.mxu0 %vm1192_vm1, %v1157_v49  ;;  %v1130_v25 = vadd.f32 %v2399_v46, %v1091_v18  ;;  %v754_v62 = vmul.f32 %v2304_v9, %v2129_v15  ;;  %v829_v57 = vmul.f32 %v2313_v53, %v2386_v43  ;;  %v288_v34 = vmul.f32 %v2258_v5, %v251_v55  ;;  %v334_v17 = vld [vmem:[%s1725_s8 + $0xc1] sm:$0xff]  ;;  %v910_v49 = vld [vmem:[%s1725_s8 + $0x95] sm:$0xff] }
  0x79   : > { %v992_v42 = vadd.f32 %v956_v11, %v883_v59  ;;  %v497_v50 = vadd.f32 %v461_v21, %v388_v61  ;;  %v361_v60 = vmul.f32 %v2264_v6, %v324_v44  ;;  %v817_v36 = vadd.f32 %v781_v20, %v708_v54  ;;  %v1019_v59 = vld [vmem:[%s1725_s8 + $0x96] sm:$0xff] }
  0x7a   : > { %v1166_v14 = vmax.f32 %v1130_v25, 0.0  ;;  %v938_v15 = vmul.f32 %v2329_v58, %v901_v47  ;;  %v470_v19 = vmul.f32 %v2272_v63, %v2146_v37  ;;  %v545_v16 = vmul.f32 %v2282_v48, %v2407_v2  ;;  %v2434_v61 = vld [vmem:[%s1725_s8 + $0xd2] sm:$0xff] }
  0x7b   : > { %v1101_v23 = vadd.f32 %v1065_v56, %v992_v42  ;;  %v572_v11 = vadd.f32 %v536_v33, %v497_v50  ;;  %v397_v52 = vadd.f32 %v361_v60, %v288_v34  ;;  %v892_v20 = vadd.f32 %v856_v51, %v817_v36  ;;  %v627_v25 = vld [vmem:[%s1725_s8 + $0xd3] sm:$0xff]  ;;  %v270_v34 = vld [vmem:[%s1725_s8 + $0x108] sm:$0xff] }
  0x7c   : > { %1579 = vmatmul.msk.f32.gmra.mxu1 %vm1192_vm1, %v1166_v14  ;;  %v1047_v21 = vmul.f32 %v2292_v24, %v1010_v3  ;;  %v654_v37 = vmul.f32 %v2298_v10, %v617_v13  ;;  %v763_v56 = vmul.f32 %v2304_v9, %v2156_v40  ;;  %v838_v44 = vmul.f32 %v2313_v53, %v2417_v7  ;;  %v2443_v3 = vld [vmem:[%s1725_s8 + $0xe4] sm:$0xff] }
  0x7d   : > { %v1140_v18 = vadd.f32 %v2399_v46, %v1101_v23  ;;  %v681_v22 = vadd.f32 %v645_v39, %v572_v11  ;;  %v506_v55 = vadd.f32 %v470_v19, %v397_v52  ;;  %v1001_v51 = vadd.f32 %v965_v1, %v892_v20  ;;  %v1029_v11 = vld [vmem:[%s1725_s8 + $0xe6] sm:$0xff]  ;;  %v2461_v20 = vld [vmem:[%s1725_s8 + $0x11a] sm:$0xff] }
  0x7e   : > { %v298_v33 = vmul.f32 %v2258_v5, %v261_v45  ;;  %v371_v47 = vmul.f32 %v2264_v6, %v334_v17  ;;  %v480_v40 = vmul.f32 %v2272_v63, %v2173_v12  ;;  %v947_v50 = vmul.f32 %v2329_v58, %v910_v49  ;;  %v343_v12 = vld [vmem:[%s1725_s8 + $0x109] sm:$0xff] }
  0x7f   : > { %v1176_v54 = vmax.f32 %v1140_v18, 0.0  ;;  %v790_v39 = vadd.f32 %v754_v62, %v681_v22  ;;  %v581_v42 = vadd.f32 %v545_v16, %v506_v55  ;;  %v1110_v60 = vadd.f32 %v1074_v28, %v1001_v51  ;;  %v920_v28 = vld [vmem:[%s1725_s8 + $0xe5] sm:$0xff]  ;;  %v636_v18 = vld [vmem:[%s1725_s8 + $0x11b] sm:$0xff] }
  0x80   : > { %v1056_v1 = vmul.f32 %v2292_v24, %v1019_v59  ;;  %v407_v13 = vadd.f32 %v371_v47, %v298_v33  ;;  %v555_v14 = vmul.f32 %v2282_v48, %v2434_v61  ;;  %v664_v19 = vmul.f32 %v2298_v10, %v627_v25  ;;  %v2468_v22 = vld [vmem:[%s1725_s8 + $0x12c] sm:$0xff] }
  0x81   : > { %1589 = vmatmul.msk.f32.gmra.mxu2 %vm1192_vm1, %v1176_v54  ;;  %v865_v62 = vadd.f32 %v829_v57, %v790_v39  ;;  %v690_v36 = vadd.f32 %v654_v37, %v581_v42  ;;  %v773_v23 = vmul.f32 %v2304_v9, %v2182_v38  ;;  %v1149_v52 = vadd.f32 %v2399_v46, %v1110_v60  ;;  %v243_v47 = vld [vmem:[%s1725_s8 + $0x30] sm:$0xff] }
  0x82   : > { %v516_v16 = vadd.f32 %v480_v40, %v407_v13  ;;  %v848_v45 = vmul.f32 %v2313_v53, %v2443_v3  ;;  %v307_v17 = vmul.f32 %v2258_v5, %v270_v34  ;;  %v380_v49 = vmul.f32 %v2264_v6, %v343_v12  ;;  %v316_v54 = vld [vmem:[%s1725_s8 + $0x31] sm:$0xff] }
  0x83   : > { %v974_v57 = vadd.f32 %v938_v15, %v865_v62  ;;  %v799_v37 = vadd.f32 %v763_v56, %v690_v36  ;;  %v489_v38 = vmul.f32 %v2272_v63, %v2200_v26  ;;  %v1185_v55 = vmax.f32 %v1149_v52, 0.0  ;;  %v929_v26 = vld [vmem:[%s1725_s8 + $0x12d] sm:$0xff]  ;;  %v2487_v62 = vld [vmem:[%s1725_s8 + $0x42] sm:$0xff] }
  0x84   : > { %v591_v59 = vadd.f32 %v555_v14, %v516_v16  ;;  %v957_v51 = vmul.f32 %v2329_v58, %v920_v28  ;;  %v1066_v33 = vmul.f32 %v2292_v24, %v1029_v11  ;;  %v416_v56 = vadd.f32 %v380_v49, %v307_v17  ;;  %v609_v36 = vld [vmem:[%s1725_s8 + $0x43] sm:$0xff]  ;;  %v2495_v52 = vld [vmem:[%s1725_s8 + $0x54] sm:$0xff] }
  0x85   : > { %v1083_v40 = vadd.f32 %v1047_v21, %v974_v57  ;;  %v874_v15 = vadd.f32 %v838_v44, %v799_v37  ;;  %v564_v25 = vmul.f32 %v2282_v48, %v2461_v20  ;;  %1598 = vmatmul.msk.f32.gmra.mxu3 %vm1192_vm1, %v1185_v55  ;;  %v673_v42 = vmul.f32 %v2298_v10, %v636_v18  ;;  %v1038_v44 = vld [vmem:[%s1725_s8 + $0x12e] sm:$0xff]  ;;  %v252_v37 = vld [vmem:[%s1725_s8 + $0x78] sm:$0xff] }
  0x86   : > { %v700_v39 = vadd.f32 %v664_v19, %v591_v59  ;;  %v782_v34 = vmul.f32 %v2304_v9, %v2207_v30  ;;  %v857_v21 = vmul.f32 %v2313_v53, %v2468_v22  ;;  %v525_v14 = vadd.f32 %v489_v38, %v416_v56  ;;  %v325_v49 = vld [vmem:[%s1725_s8 + $0x79] sm:$0xff] }
  0x87   : > { %v1122_v60 = vadd.f32 %v2399_v46, %v1083_v40  ;;  %v983_v13 = vadd.f32 %v947_v50, %v874_v15  ;;  %v280_v12 = vmul.f32 %v2258_v5, %v243_v47  ;;  %v966_v28 = vmul.f32 %v2329_v58, %v929_v26  ;;  %v2511_v40 = vld [vmem:[%s1725_s8 + $0x8a] sm:$0xff] }
  0x88   : > { %v809_v19 = vadd.f32 %v773_v23, %v700_v39  ;;  %v353_v30 = vmul.f32 %v2264_v6, %v316_v54  ;;  %v462_v11 = vmul.f32 %v2272_v63, %v2226_v31  ;;  %v600_v17 = vadd.f32 %v564_v25, %v525_v14  ;;  %v902_v31 = vld [vmem:[%s1725_s8 + $0x55] sm:$0xff]  ;;  %v618_v39 = vld [vmem:[%s1725_s8 + $0x8b] sm:$0xff] }
  0x89   : > { %v1158_v16 = vmax.f32 %v1122_v60, 0.0  ;;  %v1092_v50 = vadd.f32 %v1056_v1, %v983_v13  ;;  %v1075_v57 = vmul.f32 %v2292_v24, %v1038_v44  ;;  %v537_v18 = vmul.f32 %v2282_v48, %v2487_v62  ;;  %v1011_v25 = vld [vmem:[%s1725_s8 + $0x56] sm:$0xff] }
  0x8a   : > { %v884_v38 = vadd.f32 %v848_v45, %v809_v19  ;;  %v389_v23 = vadd.f32 %v353_v30, %v280_v12  ;;  %v646_v55 = vmul.f32 %v2298_v10, %v609_v36  ;;  %v709_v59 = vadd.f32 %v673_v42, %v600_v17  ;;  %v2521_v13 = vld [vmem:[%s1725_s8 + $0x9c] sm:$0xff]  ;;  %v262_v19 = vld [vmem:[%s1725_s8 + $0xc8] sm:$0xff] }
  0x8b   : > { %1571 = vmatmul.msk.f32.gmra.mxu0 %vm1192_vm1, %v1158_v16  ;;  %v1131_v1 = vadd.f32 %v2399_v46, %v1092_v50  ;;  %v755_v47 = vmul.f32 %v2304_v9, %v2234_v27  ;;  %v830_v45 = vmul.f32 %v2313_v53, %v2495_v52  ;;  %v289_v26 = vmul.f32 %v2258_v5, %v252_v37  ;;  %v335_v30 = vld [vmem:[%s1725_s8 + $0xc9] sm:$0xff] }
  0x8c   : > { %v993_v15 = vadd.f32 %v957_v51, %v884_v38  ;;  %v498_v56 = vadd.f32 %v462_v11, %v389_v23  ;;  %v362_v54 = vmul.f32 %v2264_v6, %v325_v49  ;;  %v818_v42 = vadd.f32 %v782_v34, %v709_v59  ;;  %v1020_v38 = vld [vmem:[%s1725_s8 + $0x9e] sm:$0xff] }
  0x8d   : > { %v1167_v44 = vmax.f32 %v1131_v1, 0.0  ;;  %v939_v27 = vmul.f32 %v2329_v58, %v902_v31  ;;  %v471_v60 = vmul.f32 %v2272_v63, %v2252_v29  ;;  %v546_v36 = vmul.f32 %v2282_v48, %v2511_v40  ;;  %v628_v31 = vld [vmem:[%s1725_s8 + $0xdb] sm:$0xff] }
  0x8e   : > { %v1102_v14 = vadd.f32 %v1066_v33, %v993_v15  ;;  %v573_v51 = vadd.f32 %v537_v18, %v498_v56  ;;  %v398_v12 = vadd.f32 %v362_v54, %v289_v26  ;;  %v893_v34 = vadd.f32 %v857_v21, %v818_v42  ;;  %v911_v33 = vld [vmem:[%s1725_s8 + $0x9d] sm:$0xff]  ;;  %v271_v56 = vld [vmem:[%s1725_s8 + $0x110] sm:$0xff] }
  0x8f   : > { %1580 = vmatmul.msk.f32.gmra.mxu1 %vm1192_vm1, %v1167_v44  ;;  %v1048_v11 = vmul.f32 %v2292_v24, %v1011_v25  ;;  %v655_v16 = vmul.f32 %v2298_v10, %v618_v39  ;;  %v764_v29 = vmul.f32 %v2304_v9, %v2277_v8  ;;  %v839_v49 = vmul.f32 %v2313_v53, %v2521_v13  ;;  %v1638_v54 = vld [vmem:[%s1725_s8 + $0xda] sm:$0xff]  ;;  %v344_v44 = vld [vmem:[%s1725_s8 + $0x111] sm:$0xff] }
  0x90   : > { %v1141_v50 = vadd.f32 %v2399_v46, %v1102_v14  ;;  %v682_v17 = vadd.f32 %v646_v55, %v573_v51  ;;  %v507_v37 = vadd.f32 %v471_v60, %v398_v12  ;;  %v1002_v21 = vadd.f32 %v966_v28, %v893_v34  ;;  %v1030_v14 = vld [vmem:[%s1725_s8 + $0xee] sm:$0xff] }
  0x91   : > { %v299_v23 = vmul.f32 %v2258_v5, %v262_v19  ;;  %v372_v18 = vmul.f32 %v2264_v6, %v335_v30  ;;  %v481_v8 = vmul.f32 %v2272_v63, %v2319_v0  ;;  %v948_v15 = vmul.f32 %v2329_v58, %v911_v33 }
  0x92   : > { %v1177_v1 = vmax.f32 %v1141_v50, 0.0  ;;  %v791_v59 = vadd.f32 %v755_v47, %v682_v17  ;;  %v582_v55 = vadd.f32 %v546_v36, %v507_v37  ;;  %v1111_v25 = vadd.f32 %v1075_v57, %v1002_v21  ;;  %v921_v57 = vld [vmem:[%s1725_s8 + $0xed] sm:$0xff]  ;;  %v637_v50 = vld [vmem:[%s1725_s8 + $0x123] sm:$0xff] }
  0x93   : > { %v1057_v28 = vmul.f32 %v2292_v24, %v1020_v38  ;;  %v408_v26 = vadd.f32 %v372_v18, %v299_v23  ;;  %v556_v39 = vmul.f32 %v1638_v54, %v2282_v48  ;;  %v665_v42 = vmul.f32 %v2298_v10, %v628_v31  ;;  %v1639_v36 = vld [vmem:[%s1725_s8 + $0xec] sm:$0xff]  ;;  %v821_v17 = vld [vmem:[%s1725_s8 + $0x134] sm:$0xff] }
  0x94   : > { %1590 = vmatmul.msk.f32.gmra.mxu2 %vm1192_vm1, %v1177_v1  ;;  %v866_v0 = vadd.f32 %v830_v45, %v791_v59  ;;  %v691_v47 = vadd.f32 %v655_v16, %v582_v55  ;;  %v774_v60 = vmul.f32 %v2304_v9, %v2333_v4  ;;  %v1150_v51 = vadd.f32 %v2399_v46, %v1111_v25  ;;  %v528_v45 = vld [vmem:[%s1725_s8 + $0x122] sm:$0xff]  ;;  %v244_v18 = vld [vmem:[%s1725_s8 + $0x38] sm:$0xff] }
  0x95   : > { %v517_v12 = vadd.f32 %v481_v8, %v408_v26  ;;  %v849_v19 = vmul.f32 %v1639_v36, %v2313_v53  ;;  %v308_v30 = vmul.f32 %v2258_v5, %v271_v56  ;;  %v381_v33 = vmul.f32 %v2264_v6, %v344_v44  ;;  %v930_v1 = vld [vmem:[%s1725_s8 + $0x135] sm:$0xff]  ;;  %v610_v44 = vld [vmem:[%s1725_s8 + $0x4b] sm:$0xff]  ;;  %v326_v36 = vld [vmem:[%s1725_s8 + $0x81] sm:$0xff] }
  0x96   : > { %v975_v34 = vadd.f32 %v939_v27, %v866_v0  ;;  %v800_v16 = vadd.f32 %v764_v29, %v691_v47  ;;  %v490_v4 = vmul.f32 %v2272_v63, %v2352_v32  ;;  %v1186_v37 = vmax.f32 %v1150_v51, 0.0  ;;  %v317_v59 = vld [vmem:[%s1725_s8 + $0x39] sm:$0xff] }
  0x97   : > { %v592_v38 = vadd.f32 %v556_v39, %v517_v12  ;;  %v958_v21 = vmul.f32 %v2329_v58, %v921_v57  ;;  %v1067_v23 = vmul.f32 %v2292_v24, %v1030_v14  ;;  %v417_v31 = vadd.f32 %v381_v33, %v308_v30  ;;  %v253_v12 = vld [vmem:[%s1725_s8 + $0x80] sm:$0xff] }
  0x98   : > { %v1084_v8 = vadd.f32 %v1048_v11, %v975_v34  ;;  %v875_v27 = vadd.f32 %v839_v49, %v800_v16  ;;  %v565_v29 = vmul.f32 %v2282_v48, %v528_v45  ;;  %1599 = vmatmul.msk.f32.gmra.mxu3 %vm1192_vm1, %v1186_v37  ;;  %v674_v55 = vmul.f32 %v2298_v10, %v637_v50  ;;  %v1039_v11 = vld [vmem:[%s1725_s8 + $0x136] sm:$0xff] }
  0x99   : > { %v701_v32 = vadd.f32 %v665_v42, %v592_v38  ;;  %v783_v56 = vmul.f32 %v2304_v9, %v2359_v35  ;;  %v858_v25 = vmul.f32 %v2313_v53, %v821_v17  ;;  %v526_v54 = vadd.f32 %v490_v4, %v417_v31  ;;  %v903_v33 = vld [vmem:[%s1725_s8 + $0x5d] sm:$0xff] }
  0x9a   : > { %v1123_v49 = vadd.f32 %v2399_v46, %v1084_v8  ;;  %v984_v26 = vadd.f32 %v948_v15, %v875_v27  ;;  %v281_v39 = vmul.f32 %v2258_v5, %v244_v18  ;;  %v967_v47 = vmul.f32 %v2329_v58, %v930_v1  ;;  %v1641_v50 = vld [vmem:[%s1725_s8 + $0x5c] sm:$0xff]  ;;  %v619_v27 = vld [vmem:[%s1725_s8 + $0x93] sm:$0xff] }
  0x9b   : > { %v810_v0 = vadd.f32 %v774_v60, %v701_v32  ;;  %v354_v42 = vmul.f32 %v2264_v6, %v317_v59  ;;  %v463_v35 = vmul.f32 %v2272_v63, %v2378_v41  ;;  %v601_v51 = vadd.f32 %v565_v29, %v526_v54  ;;  %v1640_v60 = vld [vmem:[%s1725_s8 + $0x4a] sm:$0xff]  ;;  %v1012_v38 = vld [vmem:[%s1725_s8 + $0x5e] sm:$0xff] }
  0x9c   : > { %v1159_v57 = vmax.f32 %v1123_v49, 0.0  ;;  %v1093_v14 = vadd.f32 %v1057_v28, %v984_v26  ;;  %v1076_v15 = vmul.f32 %v2292_v24, %v1039_v11  ;;  %v538_v34 = vmul.f32 %v1640_v60, %v2282_v48  ;;  %v263_v49 = vld [vmem:[%s1725_s8 + $0xd0] sm:$0xff] }
  0x9d   : > { %v885_v30 = vadd.f32 %v849_v19, %v810_v0  ;;  %v390_v45 = vadd.f32 %v354_v42, %v281_v39  ;;  %v647_v16 = vmul.f32 %v2298_v10, %v610_v44  ;;  %v710_v28 = vadd.f32 %v674_v55, %v601_v51  ;;  %v1642_v55 = vld [vmem:[%s1725_s8 + $0x92] sm:$0xff] }
  0x9e   : > { %1572 = vmatmul.msk.f32.gmra.mxu0 %vm1192_vm1, %v1159_v57  ;;  %v1132_v41 = vadd.f32 %v2399_v46, %v1093_v14  ;;  %v756_v4 = vmul.f32 %v2304_v9, %v2386_v43  ;;  %v831_v19 = vmul.f32 %v1641_v50, %v2313_v53  ;;  %v290_v18 = vmul.f32 %v2258_v5, %v253_v12  ;;  %v336_v26 = vld [vmem:[%s1725_s8 + $0xd1] sm:$0xff]  ;;  %v1021_v14 = vld [vmem:[%s1725_s8 + $0xa6] sm:$0xff] }
  0x9f   : > { %v994_v17 = vadd.f32 %v958_v21, %v885_v30  ;;  %v499_v37 = vadd.f32 %v463_v35, %v390_v45  ;;  %v363_v8 = vmul.f32 %v2264_v6, %v326_v36  ;;  %v819_v29 = vadd.f32 %v783_v56, %v710_v28  ;;  %v1643_v35 = vld [vmem:[%s1725_s8 + $0xa4] sm:$0xff] }
  0xa0   : > { %v1168_v31 = vmax.f32 %v1132_v41, 0.0  ;;  %v940_v1 = vmul.f32 %v2329_v58, %v903_v33  ;;  %v472_v43 = vmul.f32 %v2272_v63, %v2407_v2  ;;  %v547_v11 = vmul.f32 %v1642_v55, %v2282_v48  ;;  %v629_v36 = vld [vmem:[%s1725_s8 + $0xe3] sm:$0xff]  ;;  %v638_v55 = vld [vmem:[%s1725_s8 + $0x12b] sm:$0xff] }
  0xa1   : > { %v1103_v59 = vadd.f32 %v1067_v23, %v994_v17  ;;  %v574_v32 = vadd.f32 %v538_v34, %v499_v37  ;;  %v399_v21 = vadd.f32 %v363_v8, %v290_v18  ;;  %v894_v54 = vadd.f32 %v858_v25, %v819_v29  ;;  %v912_v23 = vld [vmem:[%s1725_s8 + $0xa5] sm:$0xff]  ;;  %v345_v17 = vld [vmem:[%s1725_s8 + $0x119] sm:$0xff] }
  0xa2   : > { %1581 = vmatmul.msk.f32.gmra.mxu1 %vm1192_vm1, %v1168_v31  ;;  %v1049_v56 = vmul.f32 %v2292_v24, %v1012_v38  ;;  %v656_v39 = vmul.f32 %v2298_v10, %v619_v27  ;;  %v765_v2 = vmul.f32 %v2304_v9, %v2417_v7  ;;  %v840_v57 = vmul.f32 %v1643_v35, %v2313_v53  ;;  %v1644_v28 = vld [vmem:[%s1725_s8 + $0xe2] sm:$0xff]  ;;  %v1031_v18 = vld [vmem:[%s1725_s8 + $0xf6] sm:$0xff] }
  0xa3   : > { %v1142_v44 = vadd.f32 %v2399_v46, %v1103_v59  ;;  %v683_v0 = vadd.f32 %v647_v16, %v574_v32  ;;  %v508_v42 = vadd.f32 %v472_v43, %v399_v21  ;;  %v1003_v25 = vadd.f32 %v967_v47, %v894_v54  ;;  %v272_v16 = vld [vmem:[%s1725_s8 + $0x118] sm:$0xff]  ;;  %v318_v35 = vld [vmem:[%s1725_s8 + $0x41] sm:$0xff] }
  0xa4   : > { %v300_v51 = vmul.f32 %v2258_v5, %v263_v49  ;;  %v373_v12 = vmul.f32 %v2264_v6, %v336_v26  ;;  %v482_v7 = vmul.f32 %v2272_v63, %v2434_v61  ;;  %v949_v34 = vmul.f32 %v2329_v58, %v912_v23  ;;  %v1645_v31 = vld [vmem:[%s1725_s8 + $0xf4] sm:$0xff]  ;;  %v245_v23 = vld [vmem:[%s1725_s8 + $0x40] sm:$0xff] }
  0xa5   : > { %v1178_v30 = vmax.f32 %v1142_v44, 0.0  ;;  %v792_v45 = vadd.f32 %v756_v4, %v683_v0  ;;  %v583_v60 = vadd.f32 %v547_v11, %v508_v42  ;;  %v1112_v33 = vadd.f32 %v1076_v15, %v1003_v25  ;;  %v922_v15 = vld [vmem:[%s1725_s8 + $0xf5] sm:$0xff]  ;;  %v931_v42 = vld [vmem:[%s1725_s8 + $0x13d] sm:$0xff] }
  0xa6   : > { %v1058_v47 = vmul.f32 %v2292_v24, %v1021_v14  ;;  %v409_v41 = vadd.f32 %v373_v12, %v300_v51  ;;  %v557_v50 = vmul.f32 %v1644_v28, %v2282_v48  ;;  %v666_v37 = vmul.f32 %v2298_v10, %v629_v36  ;;  %v822_v11 = vld [vmem:[%s1725_s8 + $0x13c] sm:$0xff] }
  0xa7   : > { %1591 = vmatmul.msk.f32.gmra.mxu2 %vm1192_vm1, %v1178_v30  ;;  %v867_v61 = vadd.f32 %v831_v19, %v792_v45  ;;  %v692_v4 = vadd.f32 %v656_v39, %v583_v60  ;;  %v775_v38 = vmul.f32 %v2304_v9, %v2443_v3  ;;  %v1151_v8 = vadd.f32 %v2399_v46, %v1112_v33  ;;  %v529_v19 = vld [vmem:[%s1725_s8 + $0x12a] sm:$0xff]  ;;  %v1040_v12 = vld [vmem:[%s1725_s8 + $0x13e] sm:$0xff]  ;;  %v611_v30 = vld [vmem:[%s1725_s8 + $0x53] sm:$0xff] }
  0xa8   : > { %v518_v27 = vadd.f32 %v482_v7, %v409_v41  ;;  %v850_v29 = vmul.f32 %v1645_v31, %v2313_v53  ;;  %v309_v43 = vmul.f32 %v2258_v5, %v272_v16  ;;  %v382_v21 = vmul.f32 %v2264_v6, %v345_v17  ;;  %v254_v17 = vld [vmem:[%s1725_s8 + $0x88] sm:$0xff] }
  0xa9   : > { %v976_v59 = vadd.f32 %v940_v1, %v867_v61  ;;  %v801_v32 = vadd.f32 %v765_v2, %v692_v4  ;;  %v491_v3 = vmul.f32 %v2272_v63, %v2461_v20  ;;  %v1187_v49 = vmax.f32 %v1151_v8, 0.0  ;;  %v327_v61 = vld [vmem:[%s1725_s8 + $0x89] sm:$0xff] }
  0xaa   : > { %v593_v26 = vadd.f32 %v557_v50, %v518_v27  ;;  %v959_v54 = vmul.f32 %v2329_v58, %v922_v15  ;;  %v1068_v39 = vmul.f32 %v2292_v24, %v1031_v18  ;;  %v418_v0 = vadd.f32 %v382_v21, %v309_v43  ;;  %v1376_v45 = vpop.f32.mrf.mxu2  ;;  %v904_v8 = vld [vmem:[%s1725_s8 + $0x65] sm:$0xff] }
  0xab   : > { %v1085_v44 = vadd.f32 %v1049_v56, %v976_v59  ;;  %v876_v1 = vadd.f32 %v840_v57, %v801_v32  ;;  %v566_v2 = vmul.f32 %v2282_v48, %v529_v19  ;;  %1600 = vmatmul.msk.f32.gmra.mxu3 %vm1192_vm1, %v1187_v49  ;;  %v675_v14 = vmul.f32 %v2298_v10, %v638_v55  ;;  %v1647_v31 = vld [vmem:[%s1725_s8 + $0x64] sm:$0xff]  ;;  %v1322_v55 = vpop.f32.mrf.mxu0 }
  0xac   : > { %v702_v20 = vadd.f32 %v666_v37, %v593_v26  ;;  %v784_v25 = vmul.f32 %v2304_v9, %v2468_v22  ;;  %v859_v51 = vmul.f32 %v2313_v53, %v822_v11  ;;  %v527_v7 = vadd.f32 %v491_v3, %v418_v0  ;;  %v1013_v59 = vld [vmem:[%s1725_s8 + $0x66] sm:$0xff]  ;;  %v620_v3 = vld [vmem:[%s1725_s8 + $0x9b] sm:$0xff]  ;;  %v1403_v11 = vpop.f32.mrf.mxu3 }
  0xad   : > { %v1124_v56 = vadd.f32 %v2399_v46, %v1085_v44  ;;  %v985_v57 = vadd.f32 %v949_v34, %v876_v1  ;;  %v282_v36 = vmul.f32 %v2258_v5, %v245_v23  ;;  %v968_v16 = vmul.f32 %v2329_v58, %v931_v42 }
  0xae   : > { %v811_v60 = vadd.f32 %v775_v38, %v702_v20  ;;  %v355_v22 = vmul.f32 %v2264_v6, %v318_v35  ;;  %v464_v33 = vmul.f32 %v2272_v63, %v2487_v62  ;;  %v602_v50 = vadd.f32 %v566_v2, %v527_v7  ;;  %v1646_v38 = vld [vmem:[%s1725_s8 + $0x52] sm:$0xff]  ;;  %v1349_v2 = vpop.f32.mrf.mxu1 }
  0xaf   : > { %v1160_v41 = vmax.f32 %v1124_v56, 0.0  ;;  %v1094_v28 = vadd.f32 %v1058_v47, %v985_v57  ;;  %v1077_v34 = vmul.f32 %v2292_v24, %v1040_v12  ;;  %v539_v15 = vmul.f32 %v1646_v38, %v2282_v48 }
  0xb0   : > { %v886_v4 = vadd.f32 %v850_v29, %v811_v60  ;;  %v391_v37 = vadd.f32 %v355_v22, %v282_v36  ;;  %v648_v18 = vmul.f32 %v2298_v10, %v611_v30  ;;  %v711_v47 = vadd.f32 %v675_v14, %v602_v50 }
  0xb1   : > { %1573 = vmatmul.msk.f32.gmra.mxu0 %vm1192_vm1, %v1160_v41  ;;  %v1133_v62 = vadd.f32 %v2399_v46, %v1094_v28  ;;  %v757_v27 = vmul.f32 %v2304_v9, %v2495_v52  ;;  %v832_v43 = vmul.f32 %v1647_v31, %v2313_v53  ;;  %v291_v32 = vmul.f32 %v2258_v5, %v254_v17  ;;  %v1022_v17 = vld [vmem:[%s1725_s8 + $0xae] sm:$0xff] }
  0xb2   : > { %v995_v29 = vadd.f32 %v959_v54, %v886_v4  ;;  %v500_v19 = vadd.f32 %v464_v33, %v391_v37  ;;  %v364_v21 = vmul.f32 %v2264_v6, %v327_v61  ;;  %v820_v26 = vadd.f32 %v784_v25, %v711_v47  ;;  %v2686_v54 = vld [vmem:[%s2830_s4] ss:$0 sm:$0xff]  ;;  %v1649_v25 = vld [vmem:[%s1725_s8 + $0xac] sm:$0xff] }
  0xb3   : > { %v1169_v49 = vmax.f32 %v1133_v62, 0.0  ;;  %v941_v23 = vmul.f32 %v2329_v58, %v904_v8  ;;  %v473_v52 = vmul.f32 %v2272_v63, %v2511_v40  ;;  %v1648_v6 = vld [vmem:[%s1725_s8 + $0x9a] sm:$0xff]  ;;  %v1050_v35 = vmul.f32 %v2292_v24, %v1013_v59 }
  0xb4   : > { %v1104_v44 = vadd.f32 %v1068_v39, %v995_v29  ;;  %v575_v5 = vadd.f32 %v539_v15, %v500_v19  ;;  %v400_v1 = vadd.f32 %v364_v21, %v291_v32  ;;  %v548_v0 = vmul.f32 %v1648_v6, %v2282_v48 }
  0xb5   : > { %1582 = vmatmul.msk.f32.gmra.mxu1 %vm1192_vm1, %v1169_v49  ;;  %v895_v42 = vadd.f32 %v859_v51, %v820_v26  ;;  %v657_v63 = vmul.f32 %v2298_v10, %v620_v3  ;;  %v766_v40 = vmul.f32 %v2304_v9, %v2521_v13  ;;  %v841_v48 = vmul.f32 %v1649_v25, %v2313_v53  ;;  %v913_v13 = vld [vmem:[%s1725_s8 + $0xad] sm:$0xff] }
  0xb6   : > { %v1143_v20 = vadd.f32 %v2399_v46, %v1104_v44  ;;  %v684_v39 = vadd.f32 %v648_v18, %v575_v5  ;;  %v509_v14 = vadd.f32 %v473_v52, %v400_v1  ;;  %v1323_v56 = vadd.f32 %v2686_v54, %v1322_v55 }
  0xb7   : > { %v1004_v12 = vadd.f32 %v968_v16, %v895_v42  ;;  %v1350_v51 = vadd.f32 %v2686_v54, %v1349_v2  ;;  %v1377_v9 = vadd.f32 %v2686_v54, %v1376_v45  ;;  %v1404_v16 = vadd.f32 %v2686_v54, %v1403_v11 }
  0xb8   : > { %v1379_v57 = vpop.f32.mrf.mxu2  ;;  %v1179_v7 = vmax.f32 %v1143_v20, 0.0  ;;  %v793_v10 = vadd.f32 %v757_v27, %v684_v39  ;;  %v584_v36 = vadd.f32 %v548_v0, %v509_v14  ;;  %v1430_v30 = vmax.f32 %v1323_v56, 0.0 }
  0xb9   : > { %v1113_v53 = vadd.f32 %v1077_v34, %v1004_v12  ;;  %v1439_v60 = vmax.f32 %v1350_v51, 0.0  ;;  %v1448_v41 = vmax.f32 %v1377_v9, 0.0  ;;  %v1380_v28 = vadd.f32 %v2686_v54, %v1379_v57 }
  0xba   : > { %1592 = vmatmul.msk.f32.gmra.mxu2 %vm1192_vm1, %v1179_v7  ;;  %v868_v22 = vadd.f32 %v832_v43, %v793_v10  ;;  %v693_v33 = vadd.f32 %v657_v63, %v584_v36  ;;  %1467 = vst.msk [vmem:[%s2704_s25] sm:$0xff] %vm1466_vm2, %v1430_v30  ;;  %v1457_v45 = vmax.f32 %v1404_v16, 0.0  ;;  %v950_v4 = vmul.f32 %v2329_v58, %v913_v13 }
  0xbb   : > { %v1152_v50 = vadd.f32 %v2399_v46, %v1113_v53  ;;  %1476 = vst.msk [vmem:[%s2704_s25 + $0x48] sm:$0xff] %vm1466_vm2, %v1439_v60  ;;  %v1449_v38 = vmax.f32 %v1380_v28, 0.0  ;;  %v1406_v15 = vpop.f32.mrf.mxu3  ;;  %v1059_v31 = vmul.f32 %v2292_v24, %v1022_v17 }
  0xbc   : > { %v977_v34 = vadd.f32 %v941_v23, %v868_v22  ;;  %v802_v61 = vadd.f32 %v766_v40, %v693_v33  ;;  %v1325_v37 = vpop.f32.mrf.mxu0  ;;  %1485 = vst.msk [vmem:[%s2704_s25 + $0x90] sm:$0xff] %vm1466_vm2, %v1448_v41  ;;  %v1407_v62 = vadd.f32 %v2686_v54, %v1406_v15 }
  0xbd   : > { %v1188_v18 = vmax.f32 %v1152_v50, 0.0  ;;  %v1326_v8 = vadd.f32 %v2686_v54, %v1325_v37  ;;  %1494 = vst.msk [vmem:[%s2704_s25 + $0xd8] sm:$0xff] %vm1466_vm2, %v1457_v45 }
  0xbe   : > { %v1086_v47 = vadd.f32 %v1050_v35, %v977_v34  ;;  %v877_v27 = vadd.f32 %v841_v48, %v802_v61  ;;  %1486 = vst.msk [vmem:[%s2704_s25 + $0x98] sm:$0xff] %vm1466_vm2, %v1449_v38  ;;  %v1458_v43 = vmax.f32 %v1407_v62, 0.0 }
  0xbf   : > { %1601 = vmatmul.msk.f32.gmra.mxu3 %vm1192_vm1, %v1188_v18  ;;  %v1431_v58 = vmax.f32 %v1326_v8, 0.0 }
  0xc0   : > { %v1125_v29 = vadd.f32 %v2399_v46, %v1086_v47  ;;  %v986_v19 = vadd.f32 %v950_v4, %v877_v27  ;;  %v1352_v59 = vpop.f32.mrf.mxu1  ;;  %1495 = vst.msk [vmem:[%s2704_s25 + $0xe0] sm:$0xff] %vm1466_vm2, %v1458_v43 }
  0xc1   : > { %1468 = vst.msk [vmem:[%s2704_s25 + $0x8] sm:$0xff] %vm1466_vm2, %v1431_v58  ;;  %v1353_v24 = vadd.f32 %v2686_v54, %v1352_v59 }
  0xc2   : > { %v1161_v32 = vmax.f32 %v1125_v29, 0.0  ;;  %v1095_v21 = vadd.f32 %v1059_v31, %v986_v19 }
  0xc3   : > { %v1440_v55 = vmax.f32 %v1353_v24, 0.0 }
  0xc4   : > { %1574 = vmatmul.msk.f32.gmra.mxu0 %vm1192_vm1, %v1161_v32  ;;  %v1134_v3 = vadd.f32 %v2399_v46, %v1095_v21 }
  0xc5   : > { %1477 = vst.msk [vmem:[%s2704_s25 + $0x50] sm:$0xff] %vm1466_vm2, %v1440_v55 }
  0xc6   : > { %v1170_v11 = vmax.f32 %v1134_v3, 0.0 }
  0xc8   : > { %1583 = vmatmul.msk.f32.gmra.mxu1 %vm1192_vm1, %v1170_v11 }
  0xcb   : > { %v1382_v49 = vpop.f32.mrf.mxu2 }
  0xcc   : > { %v1383_v26 = vadd.f32 %v2686_v54, %v1382_v49 }
  0xce   : > { %v1328_v23 = vpop.f32.mrf.mxu0  ;;  %v1450_v52 = vmax.f32 %v1383_v26, 0.0 }
  0xcf   : > { %v1329_v44 = vadd.f32 %v2686_v54, %v1328_v23 }
  0xd0   : > { %1487 = vst.msk [vmem:[%s2704_s25 + $0xa0] sm:$0xff] %vm1466_vm2, %v1450_v52  ;;  %v1409_v5 = vpop.f32.mrf.mxu3 }
  0xd1   : > { %v1432_v46 = vmax.f32 %v1329_v44, 0.0  ;;  %v1410_v1 = vadd.f32 %v2686_v54, %v1409_v5 }
  0xd3   : > { %1469 = vst.msk [vmem:[%s2704_s25 + $0x10] sm:$0xff] %vm1466_vm2, %v1432_v46  ;;  %v1355_v6 = vpop.f32.mrf.mxu1  ;;  %v1459_v0 = vmax.f32 %v1410_v1, 0.0 }
  0xd4   : > { %v1356_v2 = vadd.f32 %v2686_v54, %v1355_v6 }
  0xd5   : > { %1496 = vst.msk [vmem:[%s2704_s25 + $0xe8] sm:$0xff] %vm1466_vm2, %v1459_v0 }
  0xd6   : > { %v1441_v42 = vmax.f32 %v1356_v2, 0.0 }
  0xd8   : > { %1478 = vst.msk [vmem:[%s2704_s25 + $0x58] sm:$0xff] %vm1466_vm2, %v1441_v42 }
  0xde   : > { %v1385_v35 = vpop.f32.mrf.mxu2 }
  0xdf   : > { %v1386_v63 = vadd.f32 %v2686_v54, %v1385_v35 }
  0xe1   : > { %v1451_v40 = vmax.f32 %v1386_v63, 0.0  ;;  %v1331_v20 = vpop.f32.mrf.mxu0 }
  0xe2   : > { %v1332_v39 = vadd.f32 %v2686_v54, %v1331_v20 }
  0xe3   : > { %1488 = vst.msk [vmem:[%s2704_s25 + $0xa8] sm:$0xff] %vm1466_vm2, %v1451_v40  ;;  %v1412_v14 = vpop.f32.mrf.mxu3 }
  0xe4   : > { %v1413_v25 = vadd.f32 %v2686_v54, %v1412_v14  ;;  %v1433_v48 = vmax.f32 %v1332_v39, 0.0 }
  0xe6   : > { %v1358_v12 = vpop.f32.mrf.mxu1  ;;  %v1460_v56 = vmax.f32 %v1413_v25, 0.0  ;;  %1470 = vst.msk [vmem:[%s2704_s25 + $0x18] sm:$0xff] %vm1466_vm2, %v1433_v48 }
  0xe7   : > { %v1359_v51 = vadd.f32 %v2686_v54, %v1358_v12 }
  0xe8   : > { %1497 = vst.msk [vmem:[%s2704_s25 + $0xf0] sm:$0xff] %vm1466_vm2, %v1460_v56 }
  0xe9   : > { %v1442_v57 = vmax.f32 %v1359_v51, 0.0 }
  0xeb   : > { %1479 = vst.msk [vmem:[%s2704_s25 + $0x60] sm:$0xff] %vm1466_vm2, %v1442_v57 }
  0xf1   : > { %v1388_v7 = vpop.f32.mrf.mxu2 }
  0xf2   : > { %v1389_v10 = vadd.f32 %v2686_v54, %v1388_v7 }
  0xf4   : > { %v1452_v36 = vmax.f32 %v1389_v10, 0.0 }
  0xf5   : > { %v1334_v9 = vpop.f32.mrf.mxu0 }
  0xf6   : > { %v1335_v53 = vadd.f32 %v2686_v54, %v1334_v9  ;;  %1489 = vst.msk [vmem:[%s2704_s25 + $0xb0] sm:$0xff] %vm1466_vm2, %v1452_v36  ;;  %v1415_v13 = vpop.f32.mrf.mxu3 }
  0xf7   : > { %v1416_v30 = vadd.f32 %v2686_v54, %v1415_v13 }
  0xf8   : > { %v1434_v60 = vmax.f32 %v1335_v53, 0.0 }
  0xf9   : > { %v1361_v16 = vpop.f32.mrf.mxu1  ;;  %v1461_v22 = vmax.f32 %v1416_v30, 0.0 }
  0xfa   : > { %1471 = vst.msk [vmem:[%s2704_s25 + $0x20] sm:$0xff] %vm1466_vm2, %v1434_v60  ;;  %v1362_v33 = vadd.f32 %v2686_v54, %v1361_v16 }
  0xfb   : > { %1498 = vst.msk [vmem:[%s2704_s25 + $0xf8] sm:$0xff] %vm1466_vm2, %v1461_v22 }
  0xfc   : > { %v1443_v41 = vmax.f32 %v1362_v33, 0.0 }
  0xfe   : > { %1480 = vst.msk [vmem:[%s2704_s25 + $0x68] sm:$0xff] %vm1466_vm2, %v1443_v41 }
 0x104   : > { %v1391_v28 = vpop.f32.mrf.mxu2 }
 0x105   : > { %v1392_v50 = vadd.f32 %v2686_v54, %v1391_v28 }
 0x107   : > { %v1453_v17 = vmax.f32 %v1392_v50, 0.0 }
 0x108   : > { %v1337_v45 = vpop.f32.mrf.mxu0  ;;  %v1418_v61 = vpop.f32.mrf.mxu3 }
 0x109   : > { %v1338_v34 = vadd.f32 %v2686_v54, %v1337_v45  ;;  %1490 = vst.msk [vmem:[%s2704_s25 + $0xb8] sm:$0xff] %vm1466_vm2, %v1453_v17  ;;  %v1419_v4 = vadd.f32 %v2686_v54, %v1418_v61 }
 0x10b   : > { %v1435_v37 = vmax.f32 %v1338_v34, 0.0  ;;  %v1462_v15 = vmax.f32 %v1419_v4, 0.0 }
 0x10c   : > { %v1364_v38 = vpop.f32.mrf.mxu1 }
 0x10d   : > { %1472 = vst.msk [vmem:[%s2704_s25 + $0x28] sm:$0xff] %vm1466_vm2, %v1435_v37  ;;  %v1365_v18 = vadd.f32 %v2686_v54, %v1364_v38 }
 0x10e   : > { %1499 = vst.msk [vmem:[%s2704_s25 + $0x100] sm:$0xff] %vm1466_vm2, %v1462_v15 }
 0x10f   : > { %v1444_v8 = vmax.f32 %v1365_v18, 0.0 }
 0x111   : > { %1481 = vst.msk [vmem:[%s2704_s25 + $0x70] sm:$0xff] %vm1466_vm2, %v1444_v8 }
 0x117   : > { %v1394_v62 = vpop.f32.mrf.mxu2 }
 0x118   : > { %v1395_v47 = vadd.f32 %v2686_v54, %v1394_v62 }
 0x11a   : > { %v1454_v27 = vmax.f32 %v1395_v47, 0.0 }
 0x11b   : > { %v1340_v31 = vpop.f32.mrf.mxu0  ;;  %v1421_v43 = vpop.f32.mrf.mxu3 }
 0x11c   : > { %v1341_v58 = vadd.f32 %v2686_v54, %v1340_v31  ;;  %1491 = vst.msk [vmem:[%s2704_s25 + $0xc0] sm:$0xff] %vm1466_vm2, %v1454_v27  ;;  %v1422_v29 = vadd.f32 %v2686_v54, %v1421_v43 }
 0x11e   : > { %v1436_v19 = vmax.f32 %v1341_v58, 0.0  ;;  %v1463_v32 = vmax.f32 %v1422_v29, 0.0 }
 0x11f   : > { %v1367_v59 = vpop.f32.mrf.mxu1 }
 0x120   : > { %1473 = vst.msk [vmem:[%s2704_s25 + $0x30] sm:$0xff] %vm1466_vm2, %v1436_v19  ;;  %v1368_v21 = vadd.f32 %v2686_v54, %v1367_v59 }
 0x121   : > { %1500 = vst.msk [vmem:[%s2704_s25 + $0x108] sm:$0xff] %vm1466_vm2, %v1463_v32 }
 0x122   : > { %v1445_v24 = vmax.f32 %v1368_v21, 0.0 }
 0x124   : > { %1482 = vst.msk [vmem:[%s2704_s25 + $0x78] sm:$0xff] %vm1466_vm2, %v1445_v24 }
 0x12a   : > { %v1397_v3 = vpop.f32.mrf.mxu2 }
 0x12b   : > { %v1398_v55 = vadd.f32 %v2686_v54, %v1397_v3 }
 0x12d   : > { %v1455_v11 = vmax.f32 %v1398_v55, 0.0 }
 0x12e   : > { %v1343_v49 = vpop.f32.mrf.mxu0  ;;  %v1424_v23 = vpop.f32.mrf.mxu3 }
 0x12f   : > { %v1344_v26 = vadd.f32 %v2686_v54, %v1343_v49  ;;  %1492 = vst.msk [vmem:[%s2704_s25 + $0xc8] sm:$0xff] %vm1466_vm2, %v1455_v11  ;;  %v1425_v52 = vadd.f32 %v2686_v54, %v1424_v23 }
 0x131   : > { %v1437_v44 = vmax.f32 %v1344_v26, 0.0  ;;  %v1464_v46 = vmax.f32 %v1425_v52, 0.0 }
 0x132   : > { %v1370_v5 = vpop.f32.mrf.mxu1 }
 0x133   : > { %1474 = vst.msk [vmem:[%s2704_s25 + $0x38] sm:$0xff] %vm1466_vm2, %v1437_v44  ;;  %v1371_v1 = vadd.f32 %v2686_v54, %v1370_v5 }
 0x134   : > { %1501 = vst.msk [vmem:[%s2704_s25 + $0x110] sm:$0xff] %vm1466_vm2, %v1464_v46 }
 0x135   : > { %v1446_v6 = vmax.f32 %v1371_v1, 0.0 }
 0x137   : > { %1483 = vst.msk [vmem:[%s2704_s25 + $0x80] sm:$0xff] %vm1466_vm2, %v1446_v6 }
 0x13d   : > { %v1400_v0 = vpop.f32.mrf.mxu2 }
 0x13e   : > { %v1401_v2 = vadd.f32 %v2686_v54, %v1400_v0 }
 0x140   : > { %v1456_v42 = vmax.f32 %v1401_v2, 0.0 }
 0x141   : > { %v1346_v35 = vpop.f32.mrf.mxu0 }
 0x142   : > { %v1347_v63 = vadd.f32 %v2686_v54, %v1346_v35  ;;  %1493 = vst.msk [vmem:[%s2704_s25 + $0xd0] sm:$0xff] %vm1466_vm2, %v1456_v42  ;;  %v1427_v40 = vpop.f32.mrf.mxu3 }
 0x143   : > { %v1428_v20 = vadd.f32 %v2686_v54, %v1427_v40 }
 0x144   : > { %v1438_v39 = vmax.f32 %v1347_v63, 0.0 }
 0x145   : > { %v1373_v14 = vpop.f32.mrf.mxu1  ;;  %v1465_v25 = vmax.f32 %v1428_v20, 0.0 }
 0x146   : > { %1475 = vst.msk [vmem:[%s2704_s25 + $0x40] sm:$0xff] %vm1466_vm2, %v1438_v39  ;;  %v1374_v48 = vadd.f32 %v2686_v54, %v1373_v14 }
 0x147   : > { %1502 = vst.msk [vmem:[%s2704_s25 + $0x118] sm:$0xff] %vm1466_vm2, %v1465_v25 }
 0x148   : > { %v1447_v12 = vmax.f32 %v1374_v48, 0.0 }
 0x14a   : > { %1484 = vst.msk [vmem:[%s2704_s25 + $0x88] sm:$0xff] %vm1466_vm2, %v1447_v12 }
 0x14b PF: > { %s15_s18 = sadd.s32 1, %s1656_s18  }
 0x14c   : > { %p12_p4 = scmp.ge.s32.totalorder %s15_s18, 4  }
 0x14e   :  { %14 = sbr.rel (!%p12_p4) target bundleno = 1 (0x1), region = 70 }

</bundles_post_ra>
